<compile_context>
chip_gen: v6e
topology: v6e:2x2x1
jax: 0.10.0
libtpu: 0.0.40
codegen_flags: <defaults>
</compile_context>

<pallas_src>
import jax
import jax.numpy as jnp
from jax import lax
from jax.experimental import pallas as pl
from jax.experimental.pallas import tpu as pltpu


# ----------------------------------------------------------------------------
# Fused kernel: one image per grid step.
#   x_ref : (1, H*W, Cin)        flattened NHWC image, f32
#   w1    : (Cin, Cmid)          conv1 weight (1x1) with BN2 scale folded, bf16
#   s1,b1 : (1, Cin)             folded BN1 scale / bias, f32
#   b2    : (1, Cmid)            folded BN2 bias, f32
#   w2    : (3, 3*Cmid, Cgr)     conv2 weight, (kh, kw*Cmid+c, g) layout, bf16
#   o_ref : (1, H*W, Cgr)        output features (NHWC, flattened), f32
#   shift_ref : VMEM (H+2, W, 3*Cmid) bf16 scratch:
#       shift_ref[i, j, kw*Cmid + c] == mid_padded[i, j + kw, c]
#     where mid_padded is relu(bn2(conv1(...))) with a 1-pixel zero border.
# ----------------------------------------------------------------------------
def _dense_layer_fused_kernel(x_ref, w1_ref, s1_ref, b1_ref, b2_ref, w2_ref,
                              o_ref, shift_ref):
    hp, w, c3 = shift_ref.shape
    cmid = c3 // 3
    h = hp - 2
    hw = h * w
    cdt = shift_ref.dtype  # bf16

    # ---- Stage A: BN1 -> ReLU -> 1x1 conv (bf16 MXU, f32 acc) -> +b2 -> ReLU
    x = x_ref[0]                                                   # (HW, Cin) f32
    a = jnp.maximum(x * s1_ref[...] + b1_ref[...], 0.0)            # f32 VPU math
    mid = jnp.dot(a.astype(jnp.bfloat16), w1_ref[...],
                  preferred_element_type=jnp.float32)              # (HW, Cmid) f32
    mid = jnp.maximum(mid + b2_ref[...], 0.0)                      # BN2 scale folded in w1
    mid3 = mid.reshape(h, w, cmid)                                 # (H, W, Cmid) f32

    # ---- Stage B: build the 3 column-shifted copies along the lane axis -----
    # Only the two halo rows need zeroing each step; everything else (including
    # the zero halo columns of the kw=0 / kw=2 copies) is fully overwritten.
    zrow = jnp.zeros((w, c3), cdt)
    shift_ref[0] = zrow
    shift_ref[hp - 1] = zrow

    zcol = jnp.zeros((h, 1, cmid), jnp.float32)
    # kw=1 (center): mid_padded[., j+1] == mid[., j]
    shift_ref[1:h + 1, :, cmid:2 * cmid] = mid3.astype(cdt)
    # kw=0 (left):   mid_padded[., j]   == mid[., j-1], zero at j=0
    shift_ref[1:h + 1, :, 0:cmid] = jnp.concatenate(
        [zcol, mid3[:, :w - 1, :]], axis=1).astype(cdt)
    # kw=2 (right):  mid_padded[., j+2] == mid[., j+1], zero at j=W-1
    shift_ref[1:h + 1, :, 2 * cmid:3 * cmid] = jnp.concatenate(
        [mid3[:, 1:, :], zcol], axis=1).astype(cdt)

    # ---- Stage C: 3x3 conv = 3 matmuls (kw folded into K), single store -----
    acc = None
    for kh in range(3):
        # Row-offset slice is tile-aligned (whole (W, 3*Cmid) planes); the
        # reshape is a free view when W is a sublane multiple.
        patch = shift_ref[kh:kh + h].reshape(hw, c3)               # (HW, 3*Cmid) bf16
        d = jnp.dot(patch, w2_ref[kh],
                    preferred_element_type=jnp.float32)            # (HW, Cgr) f32
        acc = d if acc is None else acc + d
    o_ref[0] = acc.astype(o_ref.dtype)                             # one store pass


# ----------------------------------------------------------------------------
# Full DenseLayer forward (NCHW in / NCHW out, like PyTorch).
# ----------------------------------------------------------------------------
def dense_layer_forward(x_nchw, params):
    N, Cin, H, W = x_nchw.shape
    w1 = params["w1"]                      # (Cin, Cmid) f32
    w2 = params["w2"]                      # (3, 3, Cmid, Cgr) f32, HWIO
    s1, b1 = params["s1"], params["b1"]    # (1, Cin) f32
    s2, b2 = params["s2"], params["b2"]    # (1, Cmid) f32
    Cmid = w1.shape[1]
    Cgr = w2.shape[-1]
    HW = H * W

    # Fold BN2 scale into the 1x1 conv weight; reshape conv2 weight so that
    # w2r[kh, kw*Cmid + c, g] == w2[kh, kw, c, g].  Both cast to bf16 for MXU.
    w1p = (w1 * s2).astype(jnp.bfloat16)                  # (Cin, Cmid) bf16
    w2r = w2.reshape(3, 3 * Cmid, Cgr).astype(jnp.bfloat16)

    # NCHW -> flattened NHWC (boundary glue; see TODO at top).
    x_flat = jnp.transpose(x_nchw, (0, 2, 3, 1)).astype(jnp.float32)
    x_flat = x_flat.reshape(N, HW, Cin)

    out_flat = pl.pallas_call(
        _dense_layer_fused_kernel,
        out_shape=jax.ShapeDtypeStruct((N, HW, Cgr), jnp.float32),
        grid_spec=pltpu.PrefetchScalarGridSpec(
            num_scalar_prefetch=0,
            grid=(N,),
            in_specs=[
                pl.BlockSpec((1, HW, Cin), lambda n: (n, 0, 0)),       # x
                pl.BlockSpec((Cin, Cmid), lambda n: (0, 0)),           # w1 (scaled)
                pl.BlockSpec((1, Cin), lambda n: (0, 0)),              # s1
                pl.BlockSpec((1, Cin), lambda n: (0, 0)),              # b1
                pl.BlockSpec((1, Cmid), lambda n: (0, 0)),             # b2
                pl.BlockSpec((3, 3 * Cmid, Cgr), lambda n: (0, 0, 0)), # w2 (3*Cmid K)
            ],
            out_specs=pl.BlockSpec((1, HW, Cgr), lambda n: (n, 0, 0)),
            scratch_shapes=[pltpu.VMEM((H + 2, W, 3 * Cmid), jnp.bfloat16)],
        ),
        compiler_params=pltpu.CompilerParams(
            dimension_semantics=("parallel",),
            # Safe on all gens: <= ~56 MiB headroom rule for v7x's 64 MiB VMEM;
            # could be raised to ~96 MiB on v5e/v6e (128 MiB parts).
            vmem_limit_bytes=48 * 1024 * 1024,
        ),
    )(x_flat, w1p, s1, b1, b2, w2r)

    # flattened NHWC -> NCHW, then channel concat (glue; see TODO at top).
    out_nchw = jnp.transpose(out_flat.reshape(N, H, W, Cgr), (0, 3, 1, 2))
    return jnp.concatenate([x_nchw.astype(jnp.float32), out_nchw], axis=1)


# ----------------------------------------------------------------------------
# Pure-JAX f32 reference (for correctness check).
# ----------------------------------------------------------------------------
def reference_forward(x_nchw, params):
    w1, w2 = params["w1"], params["w2"]
    s1, b1 = params["s1"], params["b1"]
    s2, b2 = params["s2"], params["b2"]
    x = x_nchw.astype(jnp.float32)
    # BN1 + ReLU (per-channel, channels at axis 1)
    a = jnp.maximum(x * s1[0][None, :, None, None] + b1[0][None, :, None, None], 0.0)
    # 1x1 conv
    k1 = jnp.transpose(w1, (1, 0))[:, :, None, None]          # (Cmid, Cin, 1, 1)
    y = lax.conv_general_dilated(a, k1, (1, 1), "VALID",
                                 dimension_numbers=("NCHW", "OIHW", "NCHW"))
    # BN2 + ReLU
    a2 = jnp.maximum(y * s2[0][None, :, None, None] + b2[0][None, :, None, None], 0.0)
    # 3x3 conv, pad 1
    k2 = jnp.transpose(w2, (3, 2, 0, 1))                       # (Cgr, Cmid, 3, 3)
    out = lax.conv_general_dilated(a2, k2, (1, 1), ((1, 1), (1, 1)),
                                   dimension_numbers=("NCHW", "OIHW", "NCHW"))
    return jnp.concatenate([x, out], axis=1)


# ----------------------------------------------------------------------------
# Deterministic parameter construction (synthetic, inference-mode BN fold).
# TODO(synk): training-mode BatchNorm (batch statistics + running-stat update)
# is not implemented; the kernel uses the standard inference-time folding.
# ----------------------------------------------------------------------------
def make_params(key, in_channels, growth_rate, eps=1e-5):
    Cmid = 4 * growth_rate
    k1, k2, k3, k4, k5, k6, k7, k8 = jax.random.split(key, 8)
    w1 = 0.1 * jax.random.normal(k1, (in_channels, Cmid), jnp.float32)
    w2 = 0.1 * jax.random.normal(k2, (3, 3, Cmid, growth_rate), jnp.float32)
    # BN1
    g1 = 1.0 + 0.1 * jax.random.normal(k3, (in_channels,), jnp.float32)
    be1 = 0.1 * jax.random.normal(k4, (in_channels,), jnp.float32)
    rm1 = 0.1 * jax.random.normal(k5, (in_channels,), jnp.float32)
    rv1 = jnp.abs(1.0 + 0.1 * jax.random.normal(k6, (in_channels,), jnp.float32))
    s1 = g1 / jnp.sqrt(rv1 + eps)
    b1 = be1 - rm1 * s1
    # BN2
    g2 = 1.0 + 0.1 * jax.random.normal(k7, (Cmid,), jnp.float32)
    be2 = 0.1 * jax.random.normal(k8, (Cmid,), jnp.float32)
    rm2 = jnp.zeros((Cmid,), jnp.float32)
    rv2 = jnp.ones((Cmid,), jnp.float32)
    s2 = g2 / jnp.sqrt(rv2 + eps)
    b2 = be2 - rm2 * s2
    return {
        "w1": w1, "w2": w2,
        "s1": s1[None, :], "b1": b1[None, :],
        "s2": s2[None, :], "b2": b2[None, :],
    }


if __name__ == "__main__":
    # Small shapes: batch=2, in_channels=4, growth_rate=4, spatial=16x16
    N, Cin, H, W = 2, 4, 16, 16
    growth_rate = 4

    key = jax.random.PRNGKey(0)
    kx, kp = jax.random.split(key)
    x = jax.random.normal(kx, (N, Cin, H, W), jnp.float32)   # NCHW, like PyTorch
    params = make_params(kp, Cin, growth_rate)

    out = jax.block_until_ready(dense_layer_forward(x, params))
    ref = jax.block_until_ready(reference_forward(x, params))

    assert out.shape == (N, Cin + growth_rate, H, W), out.shape
    # bf16 MXU operands vs f32 reference: relaxed tolerance (per perf review).
    assert jnp.allclose(out, ref, atol=2e-2, rtol=2e-2), float(
        jnp.max(jnp.abs(out - ref)))
    print("KERNEL_OK")
</pallas_src>

<mosaic_0001>
module attributes {stable_mosaic.version = 11 : i64} {
  func.func @_dense_layer_fused_kernel(%arg0: i32, %arg1: memref<1x256x4xf32, #tpu.memory_space<vmem>>, %arg2: memref<4x16xbf16, #tpu.memory_space<vmem>>, %arg3: memref<1x4xf32, #tpu.memory_space<vmem>>, %arg4: memref<1x4xf32, #tpu.memory_space<vmem>>, %arg5: memref<1x16xf32, #tpu.memory_space<vmem>>, %arg6: memref<3x48x4xbf16, #tpu.memory_space<vmem>>, %arg7: memref<1x256x4xf32, #tpu.memory_space<vmem>>, %arg8: memref<18x16x48xbf16, #tpu.memory_space<vmem>>) attributes {dimension_semantics = [#tpu.dimension_semantics<parallel>], iteration_bounds = array<i64: 2>, scalar_prefetch = 0 : i64, scratch_operands = 1 : i64, tpu.core_type = #tpu.core_type<tc>, window_params = [{transform_indices = @transform_0, window_bounds = array<i64: 1, 256, 4>}, {pipeline_mode = #tpu.pipeline_mode<synchronous>, transform_indices = @transform_1, window_bounds = array<i64: 4, 16>}, {pipeline_mode = #tpu.pipeline_mode<synchronous>, transform_indices = @transform_2, window_bounds = array<i64: 1, 4>}, {pipeline_mode = #tpu.pipeline_mode<synchronous>, transform_indices = @transform_3, window_bounds = array<i64: 1, 4>}, {pipeline_mode = #tpu.pipeline_mode<synchronous>, transform_indices = @transform_4, window_bounds = array<i64: 1, 16>}, {pipeline_mode = #tpu.pipeline_mode<synchronous>, transform_indices = @transform_5, window_bounds = array<i64: 3, 48, 4>}, {transform_indices = @transform_6, window_bounds = array<i64: 1, 256, 4>}]} {
    %c0 = arith.constant 0 : index
    %c0_0 = arith.constant 0 : index
    %c0_1 = arith.constant 0 : index
    %0 = vector.load %arg1[%c0, %c0_0, %c0_1] : memref<1x256x4xf32, #tpu.memory_space<vmem>>, vector<1x256x4xf32>
    %1 = vector.shape_cast %0 : vector<1x256x4xf32> to vector<256x4xf32>
    %c0_2 = arith.constant 0 : index
    %c0_3 = arith.constant 0 : index
    %2 = vector.load %arg3[%c0_2, %c0_3] : memref<1x4xf32, #tpu.memory_space<vmem>>, vector<1x4xf32>
    %3 = vector.broadcast %2 : vector<1x4xf32> to vector<256x4xf32>
    %4 = arith.mulf %1, %3 : vector<256x4xf32>
    %c0_4 = arith.constant 0 : index
    %c0_5 = arith.constant 0 : index
    %5 = vector.load %arg4[%c0_4, %c0_5] : memref<1x4xf32, #tpu.memory_space<vmem>>, vector<1x4xf32>
    %6 = vector.broadcast %5 : vector<1x4xf32> to vector<256x4xf32>
    %7 = arith.addf %4, %6 : vector<256x4xf32>
    %cst = arith.constant 0.000000e+00 : f32
    %8 = vector.broadcast %cst : f32 to vector<256x4xf32>
    %9 = arith.maximumf %7, %8 : vector<256x4xf32>
    %10 = arith.truncf %9 : vector<256x4xf32> to vector<256x4xbf16>
    %c0_6 = arith.constant 0 : index
    %c0_7 = arith.constant 0 : index
    %11 = vector.load %arg2[%c0_6, %c0_7] : memref<4x16xbf16, #tpu.memory_space<vmem>>, vector<4x16xbf16>
    %cst_8 = arith.constant dense<0.000000e+00> : vector<256x16xf32>
    %12 = tpu.matmul %10, %11, %cst_8 {dimension_numbers = #tpu.dot_dimension_numbers<[1], [0], [0], [1], [0, 0, 1, 1], [], []>} : vector<256x4xbf16>, vector<4x16xbf16>, vector<256x16xf32> -> vector<256x16xf32>
    %c0_9 = arith.constant 0 : index
    %c0_10 = arith.constant 0 : index
    %13 = vector.load %arg5[%c0_9, %c0_10] : memref<1x16xf32, #tpu.memory_space<vmem>>, vector<1x16xf32>
    %14 = vector.broadcast %13 : vector<1x16xf32> to vector<256x16xf32>
    %15 = arith.addf %12, %14 : vector<256x16xf32>
    %cst_11 = arith.constant 0.000000e+00 : f32
    %16 = vector.broadcast %cst_11 : f32 to vector<256x16xf32>
    %17 = arith.maximumf %15, %16 : vector<256x16xf32>
    %18 = vector.shape_cast %17 : vector<256x16xf32> to vector<16x16x16xf32>
    %cst_12 = arith.constant 0.000000e+00 : bf16
    %19 = vector.broadcast %cst_12 : bf16 to vector<16x48xbf16>
    %c0_13 = arith.constant 0 : index
    %c0_14 = arith.constant 0 : index
    %c0_15 = arith.constant 0 : index
    %20 = vector.load %arg8[%c0_13, %c0_14, %c0_15] : memref<18x16x48xbf16, #tpu.memory_space<vmem>>, vector<1x16x48xbf16>
    %21 = vector.shape_cast %20 : vector<1x16x48xbf16> to vector<16x48xbf16>
    %22 = vector.shape_cast %19 : vector<16x48xbf16> to vector<1x16x48xbf16>
    tpu.vector_store %arg8[%c0_13, %c0_14, %c0_15], %22 {strides = array<i32>} : memref<18x16x48xbf16, #tpu.memory_space<vmem>>, vector<1x16x48xbf16>,
    %c17 = arith.constant 17 : index
    %c0_16 = arith.constant 0 : index
    %c0_17 = arith.constant 0 : index
    %23 = vector.load %arg8[%c17, %c0_16, %c0_17] : memref<18x16x48xbf16, #tpu.memory_space<vmem>>, vector<1x16x48xbf16>
    %24 = vector.shape_cast %23 : vector<1x16x48xbf16> to vector<16x48xbf16>
    %25 = vector.shape_cast %19 : vector<16x48xbf16> to vector<1x16x48xbf16>
    tpu.vector_store %arg8[%c17, %c0_16, %c0_17], %25 {strides = array<i32>} : memref<18x16x48xbf16, #tpu.memory_space<vmem>>, vector<1x16x48xbf16>,
    %cst_18 = arith.constant 0.000000e+00 : f32
    %26 = vector.broadcast %cst_18 : f32 to vector<16x1x16xf32>
    %27 = arith.truncf %18 : vector<16x16x16xf32> to vector<16x16x16xbf16>
    %c1 = arith.constant 1 : index
    %c0_19 = arith.constant 0 : index
    %c16 = arith.constant 16 : index
    %28 = vector.load %arg8[%c1, %c0_19, %c16] : memref<18x16x48xbf16, #tpu.memory_space<vmem>>, vector<16x16x16xbf16>
    tpu.vector_store %arg8[%c1, %c0_19, %c16], %27 {strides = array<i32>} : memref<18x16x48xbf16, #tpu.memory_space<vmem>>, vector<16x16x16xbf16>,
    %29 = vector.extract_strided_slice %18 {offsets = [0, 0, 0], sizes = [16, 15, 16], strides = [1, 1, 1]} : vector<16x16x16xf32> to vector<16x15x16xf32>
    %30 = tpu.concatenate %26, %29 in 1 : vector<16x1x16xf32>, vector<16x15x16xf32> -> vector<16x16x16xf32>
    %31 = arith.truncf %30 : vector<16x16x16xf32> to vector<16x16x16xbf16>
    %c1_20 = arith.constant 1 : index
    %c0_21 = arith.constant 0 : index
    %c0_22 = arith.constant 0 : index
    %32 = vector.load %arg8[%c1_20, %c0_21, %c0_22] : memref<18x16x48xbf16, #tpu.memory_space<vmem>>, vector<16x16x16xbf16>
    tpu.vector_store %arg8[%c1_20, %c0_21, %c0_22], %31 {strides = array<i32>} : memref<18x16x48xbf16, #tpu.memory_space<vmem>>, vector<16x16x16xbf16>,
    %33 = vector.extract_strided_slice %18 {offsets = [0, 1, 0], sizes = [16, 15, 16], strides = [1, 1, 1]} : vector<16x16x16xf32> to vector<16x15x16xf32>
    %34 = tpu.concatenate %33, %26 in 1 : vector<16x15x16xf32>, vector<16x1x16xf32> -> vector<16x16x16xf32>
    %35 = arith.truncf %34 : vector<16x16x16xf32> to vector<16x16x16xbf16>
    %c1_23 = arith.constant 1 : index
    %c0_24 = arith.constant 0 : index
    %c32 = arith.constant 32 : index
    %36 = vector.load %arg8[%c1_23, %c0_24, %c32] : memref<18x16x48xbf16, #tpu.memory_space<vmem>>, vector<16x16x16xbf16>
    tpu.vector_store %arg8[%c1_23, %c0_24, %c32], %35 {strides = array<i32>} : memref<18x16x48xbf16, #tpu.memory_space<vmem>>, vector<16x16x16xbf16>,
    %c0_25 = arith.constant 0 : index
    %c0_26 = arith.constant 0 : index
    %c0_27 = arith.constant 0 : index
    %37 = vector.load %arg8[%c0_25, %c0_26, %c0_27] : memref<18x16x48xbf16, #tpu.memory_space<vmem>>, vector<16x16x48xbf16>
    %38 = vector.shape_cast %37 : vector<16x16x48xbf16> to vector<256x48xbf16>
    %c0_28 = arith.constant 0 : index
    %c0_29 = arith.constant 0 : index
    %c0_30 = arith.constant 0 : index
    %39 = vector.load %arg6[%c0_28, %c0_29, %c0_30] : memref<3x48x4xbf16, #tpu.memory_space<vmem>>, vector<1x48x4xbf16>
    %40 = vector.shape_cast %39 : vector<1x48x4xbf16> to vector<48x4xbf16>
    %cst_31 = arith.constant dense<0.000000e+00> : vector<256x4xf32>
    %41 = tpu.matmul %38, %40, %cst_31 {dimension_numbers = #tpu.dot_dimension_numbers<[1], [0], [0], [1], [0, 0, 1, 1], [], []>} : vector<256x48xbf16>, vector<48x4xbf16>, vector<256x4xf32> -> vector<256x4xf32>
    %c1_32 = arith.constant 1 : index
    %c0_33 = arith.constant 0 : index
    %c0_34 = arith.constant 0 : index
    %42 = vector.load %arg8[%c1_32, %c0_33, %c0_34] : memref<18x16x48xbf16, #tpu.memory_space<vmem>>, vector<16x16x48xbf16>
    %43 = vector.shape_cast %42 : vector<16x16x48xbf16> to vector<256x48xbf16>
    %c1_35 = arith.constant 1 : index
    %c0_36 = arith.constant 0 : index
    %c0_37 = arith.constant 0 : index
    %44 = vector.load %arg6[%c1_35, %c0_36, %c0_37] : memref<3x48x4xbf16, #tpu.memory_space<vmem>>, vector<1x48x4xbf16>
    %45 = vector.shape_cast %44 : vector<1x48x4xbf16> to vector<48x4xbf16>
    %cst_38 = arith.constant dense<0.000000e+00> : vector<256x4xf32>
    %46 = tpu.matmul %43, %45, %cst_38 {dimension_numbers = #tpu.dot_dimension_numbers<[1], [0], [0], [1], [0, 0, 1, 1], [], []>} : vector<256x48xbf16>, vector<48x4xbf16>, vector<256x4xf32> -> vector<256x4xf32>
    %47 = arith.addf %41, %46 : vector<256x4xf32>
    %c2 = arith.constant 2 : index
    %c0_39 = arith.constant 0 : index
    %c0_40 = arith.constant 0 : index
    %48 = vector.load %arg8[%c2, %c0_39, %c0_40] : memref<18x16x48xbf16, #tpu.memory_space<vmem>>, vector<16x16x48xbf16>
    %49 = vector.shape_cast %48 : vector<16x16x48xbf16> to vector<256x48xbf16>
    %c2_41 = arith.constant 2 : index
    %c0_42 = arith.constant 0 : index
    %c0_43 = arith.constant 0 : index
    %50 = vector.load %arg6[%c2_41, %c0_42, %c0_43] : memref<3x48x4xbf16, #tpu.memory_space<vmem>>, vector<1x48x4xbf16>
    %51 = vector.shape_cast %50 : vector<1x48x4xbf16> to vector<48x4xbf16>
    %cst_44 = arith.constant dense<0.000000e+00> : vector<256x4xf32>
    %52 = tpu.matmul %49, %51, %cst_44 {dimension_numbers = #tpu.dot_dimension_numbers<[1], [0], [0], [1], [0, 0, 1, 1], [], []>} : vector<256x48xbf16>, vector<48x4xbf16>, vector<256x4xf32> -> vector<256x4xf32>
    %53 = arith.addf %47, %52 : vector<256x4xf32>
    %c0_45 = arith.constant 0 : index
    %c0_46 = arith.constant 0 : index
    %c0_47 = arith.constant 0 : index
    %54 = vector.load %arg7[%c0_45, %c0_46, %c0_47] : memref<1x256x4xf32, #tpu.memory_space<vmem>>, vector<1x256x4xf32>
    %55 = vector.shape_cast %54 : vector<1x256x4xf32> to vector<256x4xf32>
    %56 = vector.shape_cast %53 : vector<256x4xf32> to vector<1x256x4xf32>
    tpu.vector_store %arg7[%c0_45, %c0_46, %c0_47], %56 {strides = array<i32>} : memref<1x256x4xf32, #tpu.memory_space<vmem>>, vector<1x256x4xf32>,
    return
  }
  func.func @transform_0(%arg0: i32) -> (i32, i32, i32) {
    %c0_i32 = arith.constant 0 : i32
    %c0_i32_0 = arith.constant 0 : i32
    %c0_i32_1 = arith.constant 0 : i32
    return %arg0, %c0_i32, %c0_i32_0 : i32, i32, i32
  }
  func.func @transform_1(%arg0: i32) -> (i32, i32) {
    %c0_i32 = arith.constant 0 : i32
    %c0_i32_0 = arith.constant 0 : i32
    %c0_i32_1 = arith.constant 0 : i32
    return %c0_i32, %c0_i32_0 : i32, i32
  }
  func.func @transform_2(%arg0: i32) -> (i32, i32) {
    %c0_i32 = arith.constant 0 : i32
    %c0_i32_0 = arith.constant 0 : i32
    %c0_i32_1 = arith.constant 0 : i32
    return %c0_i32, %c0_i32_0 : i32, i32
  }
  func.func @transform_3(%arg0: i32) -> (i32, i32) {
    %c0_i32 = arith.constant 0 : i32
    %c0_i32_0 = arith.constant 0 : i32
    %c0_i32_1 = arith.constant 0 : i32
    return %c0_i32, %c0_i32_0 : i32, i32
  }
  func.func @transform_4(%arg0: i32) -> (i32, i32) {
    %c0_i32 = arith.constant 0 : i32
    %c0_i32_0 = arith.constant 0 : i32
    %c0_i32_1 = arith.constant 0 : i32
    return %c0_i32, %c0_i32_0 : i32, i32
  }
  func.func @transform_5(%arg0: i32) -> (i32, i32, i32) {
    %c0_i32 = arith.constant 0 : i32
    %c0_i32_0 = arith.constant 0 : i32
    %c0_i32_1 = arith.constant 0 : i32
    %c0_i32_2 = arith.constant 0 : i32
    return %c0_i32, %c0_i32_0, %c0_i32_1 : i32, i32, i32
  }
  func.func @transform_6(%arg0: i32) -> (i32, i32, i32) {
    %c0_i32 = arith.constant 0 : i32
    %c0_i32_0 = arith.constant 0 : i32
    %c0_i32_1 = arith.constant 0 : i32
    return %arg0, %c0_i32, %c0_i32_0 : i32, i32, i32
  }
}

</mosaic_0001>

<bundles_post_ra>
// kernel: tpu_custom_call.1
= control target key start
LH: loop header
LB: loop body
LE: loop exit
PB: predicated region body
PF: predicated region fallthrough
CT: control target
= control target key end

     0   :  { %s3345_s21 = smov 0   ;;  %s4360_s0 = inlined_call_operand.vmem [shape: f32[2,256,4], index: 0, kind: input, shape index: {}]   ;;  %s4361_s1 = inlined_call_operand.vmem [shape: bf16[4,16], index: 1, kind: input, shape index: {}]   ;;  %s4362_s2 = inlined_call_operand.vmem [shape: f32[1,4], index: 2, kind: input, shape index: {}]   ;;  %s4363_s3 = inlined_call_operand.vmem [shape: f32[1,4], index: 3, kind: input, shape index: {}]   ;;  %s4364_s4 = inlined_call_operand.vmem [shape: f32[1,16], index: 4, kind: input, shape index: {}]   ;;  %s4365_s5 = inlined_call_operand.vmem [shape: bf16[3,48,4], index: 5, kind: input, shape index: {}]   ;;  %s4366_s6 = inlined_call_operand.vmem [shape: f32[2,256,4], index: 6, kind: output, shape index: {}]  }
   0x1 LB: > { %s2667_s22 = sadd.s32 4294967295, %s3305_s21   ;;  %p2671_p0 = scmp.ge.s32.totalorder %s3305_s21, 1  ;;  %s3305_s21 = sphi %s3345_s21, %s16_s21  }
   0x2   : > { %p212_p1 = scmp.lt.s32.totalorder %s3305_s21, 3 }
   0x4   : > { %p213_p2 = pnand %p2671_p0, %p212_p1 }
   0x6   : > { %216 = sbr.rel (%p213_p2) target bundleno = 740 (0x2e4), region = 44 }
   0xb   : > { %v411_v0 = vld [vmem:[%s4361_s1] sm:$0x3]  ;;  %vm468_vm0 = vcmask 1041408   ;;  %p242_p3 = scmp.lt.s32.totalorder %s2667_s22, 1  ;;  %vm419_vm1 = vcmask 31744   ;;  %s3307_s11 = smov 16  }
   0xc   : > { %3230 = vmatprep.subr.msk.bf16.mxu0 %vm468_vm0, %v411_v0  ;;  %v470_v1 = vsel %vm468_vm0, %v411_v0, 0  ;;  %v3361_v2 = vld [vmem:[%s4362_s2] ss:$0 sm:$0xff]  ;;  %vm1187_vm2 = vcmask 1046528   ;;  %vm929_vm3 = vcmask 1040384   ;;  %s3308_s16 = smov 32  }
   0xd   : > { %3083 = vmatpush3.bf16.msra.mxu0 %v470_v1  ;;  %s4398_s22 = smov (!%p242_p3, %s2667_s22), 1  ;;  %v3367_v3 = vld [vmem:[%s4363_s3] ss:$0 sm:$0xff]  ;;  %vm665_vm4 = vcmask 388096   ;;  %vm1684_vm5 = vcmask 392192   ;;  %vm864_vm6 = vcmask 257152  }
   0xe   : > { %s2910_s27 = sshll.u32 %s4398_s22, 8  ;;  %vm1154_vm7 = vcmask 125952   ;;  %vm1476_vm8 = vcmask 388352  }
   0xf   : > { %s3374_s8 = scalar_lea.vmem %s4360_s0, %s2910_s27  ;;  %s4263_s12 = scalar_lea.vmem %s4366_s6, %s2910_s27 }
  0x10   : > { %v253_v4 = vld [vmem:[%s3374_s8] sm:$0xff]  ;;  %v254_v5 = vld [vmem:[%s3374_s8 + $0x8] sm:$0xff]  ;;  %v255_v6 = vld [vmem:[%s3374_s8 + $0x10] sm:$0xff] }
  0x11   : > { %v292_v7 = vmul.f32 %v3361_v2, %v253_v4  ;;  %v293_v8 = vmul.f32 %v3361_v2, %v254_v5  ;;  %v256_v9 = vld [vmem:[%s3374_s8 + $0x18] sm:$0xff]  ;;  %v294_v10 = vmul.f32 %v3361_v2, %v255_v6  ;;  %v257_v11 = vld [vmem:[%s3374_s8 + $0x20] sm:$0xff]  ;;  %v258_v12 = vld [vmem:[%s3374_s8 + $0x28] sm:$0xff] }
  0x12   : > { %v295_v13 = vmul.f32 %v3361_v2, %v256_v9  ;;  %v296_v14 = vmul.f32 %v3361_v2, %v257_v11  ;;  %v297_v15 = vmul.f32 %v3361_v2, %v258_v12  ;;  %v259_v16 = vld [vmem:[%s3374_s8 + $0x30] sm:$0xff]  ;;  %v260_v17 = vld [vmem:[%s3374_s8 + $0x38] sm:$0xff]  ;;  %v261_v26 = vld [vmem:[%s3374_s8 + $0x40] sm:$0xff] }
  0x13   : > { %v331_v18 = vadd.f32 %v3367_v3, %v292_v7  ;;  %v332_v19 = vadd.f32 %v3367_v3, %v293_v8  ;;  %v333_v20 = vadd.f32 %v3367_v3, %v294_v10  ;;  %v298_v21 = vmul.f32 %v3361_v2, %v259_v16  ;;  %v262_v27 = vld [vmem:[%s3374_s8 + $0x48] sm:$0xff]  ;;  %v263_v39 = vld [vmem:[%s3374_s8 + $0x50] sm:$0xff]  ;;  %v264_v40 = vld [vmem:[%s3374_s8 + $0x58] sm:$0xff] }
  0x14   : > { %v334_v22 = vadd.f32 %v3367_v3, %v295_v13  ;;  %v335_v23 = vadd.f32 %v3367_v3, %v296_v14  ;;  %v336_v24 = vadd.f32 %v3367_v3, %v297_v15  ;;  %v299_v25 = vmul.f32 %v3361_v2, %v260_v17  ;;  %v265_v43 = vld [vmem:[%s3374_s8 + $0x60] sm:$0xff]  ;;  %v266_v44 = vld [vmem:[%s3374_s8 + $0x68] sm:$0xff]  ;;  %v267_v61 = vld [vmem:[%s3374_s8 + $0x70] sm:$0xff] }
  0x15   : > { %v363_v28 = vmax.f32 %v331_v18, 0.0  ;;  %v364_v29 = vmax.f32 %v332_v19, 0.0  ;;  %v365_v30 = vmax.f32 %v333_v20, 0.0  ;;  %v337_v31 = vadd.f32 %v3367_v3, %v298_v21  ;;  %v268_v62 = vld [vmem:[%s3374_s8 + $0x78] sm:$0xff]  ;;  %v269_v63 = vld [vmem:[%s3374_s8 + $0x80] sm:$0xff]  ;;  %v270_v0 = vld [vmem:[%s3374_s8 + $0x88] sm:$0xff] }
  0x16   : > { %v366_v32 = vmax.f32 %v334_v22, 0.0  ;;  %v367_v33 = vmax.f32 %v335_v23, 0.0  ;;  %v368_v34 = vmax.f32 %v336_v24, 0.0  ;;  %v338_v35 = vadd.f32 %v3367_v3, %v299_v25  ;;  %v271_v17 = vld [vmem:[%s3374_s8 + $0x90] sm:$0xff]  ;;  %v272_v18 = vld [vmem:[%s3374_s8 + $0x98] sm:$0xff]  ;;  %v273_v19 = vld [vmem:[%s3374_s8 + $0xa0] sm:$0xff] }
  0x17   : > { %v395_v36 = vpack.c.bf16 %v364_v29, %v363_v28  ;;  %v300_v37 = vmul.f32 %v3361_v2, %v261_v26  ;;  %v301_v38 = vmul.f32 %v3361_v2, %v262_v27  ;;  %v369_v47 = vmax.f32 %v337_v31, 0.0  ;;  %v274_v20 = vld [vmem:[%s3374_s8 + $0xa8] sm:$0xff] }
  0x18   : > { %v396_v41 = vpack.c.bf16 %v366_v32, %v365_v30  ;;  %v397_v42 = vpack.c.bf16 %v368_v34, %v367_v33  ;;  %v370_v48 = vmax.f32 %v338_v35, 0.0  ;;  %v302_v49 = vmul.f32 %v3361_v2, %v263_v39  ;;  %v275_v35 = vld [vmem:[%s3374_s8 + $0xb0] sm:$0xff] }
  0x19   : > { %3084 = vmatprep.mubr.msk.bf16.mxu0 %vm419_vm1, %v395_v36  ;;  %v339_v45 = vadd.f32 %v3367_v3, %v300_v37  ;;  %v340_v46 = vadd.f32 %v3367_v3, %v301_v38  ;;  %v303_v50 = vmul.f32 %v3361_v2, %v264_v40  ;;  %v304_v53 = vmul.f32 %v3361_v2, %v265_v43  ;;  %v276_v36 = vld [vmem:[%s3374_s8 + $0xb8] sm:$0xff]  ;;  %v277_v37 = vld [vmem:[%s3374_s8 + $0xc0] sm:$0xff]  ;;  %v278_v38 = vld [vmem:[%s3374_s8 + $0xc8] sm:$0xff] }
  0x1a   : > { %3085 = vmatmul.mubr.msk.bf16.vlgmr.msra.gmra.mxu0 %vm419_vm1, %v396_v41  ;;  %v305_v54 = vmul.f32 %v3361_v2, %v266_v44  ;;  %v398_v55 = vpack.c.bf16 %v370_v48, %v369_v47  ;;  %v341_v56 = vadd.f32 %v3367_v3, %v302_v49  ;;  %v306_v5 = vmul.f32 %v3361_v2, %v267_v61 }
  0x1b   : > { %3088 = vmatprep.mubr.msk.bf16.mxu0 %vm419_vm1, %v397_v42  ;;  %v371_v51 = vmax.f32 %v339_v45, 0.0  ;;  %v372_v52 = vmax.f32 %v340_v46, 0.0  ;;  %v342_v57 = vadd.f32 %v3367_v3, %v303_v50  ;;  %v343_v59 = vadd.f32 %v3367_v3, %v304_v53  ;;  %v279_v53 = vld [vmem:[%s3374_s8 + $0xd0] sm:$0xff] }
  0x1c   : > { %v344_v60 = vadd.f32 %v3367_v3, %v305_v54  ;;  %v373_v1 = vmax.f32 %v341_v56, 0.0  ;;  %v307_v6 = vmul.f32 %v3361_v2, %v268_v62  ;;  %v308_v9 = vmul.f32 %v3361_v2, %v269_v63  ;;  %v280_v54 = vld [vmem:[%s3374_s8 + $0xd8] sm:$0xff]  ;;  %v282_v56 = vld [vmem:[%s3374_s8 + $0xe8] sm:$0xff] }
  0x1d   : > { %v399_v58 = vpack.c.bf16 %v372_v52, %v371_v51  ;;  %v374_v4 = vmax.f32 %v342_v57, 0.0  ;;  %v375_v7 = vmax.f32 %v343_v59, 0.0  ;;  %v309_v10 = vmul.f32 %v3361_v2, %v270_v0 }
  0x1e   : > { %v376_v8 = vmax.f32 %v344_v60, 0.0  ;;  %v345_v12 = vadd.f32 %v3367_v3, %v306_v5  ;;  %v346_v13 = vadd.f32 %v3367_v3, %v307_v6  ;;  %v347_v15 = vadd.f32 %v3367_v3, %v308_v9  ;;  %v283_v9 = vld [vmem:[%s3374_s8 + $0xf0] sm:$0xff] }
  0x1f   : > { %v400_v11 = vpack.c.bf16 %v374_v4, %v373_v1  ;;  %v348_v16 = vadd.f32 %v3367_v3, %v309_v10  ;;  %v310_v23 = vmul.f32 %v3361_v2, %v271_v17  ;;  %v311_v24 = vmul.f32 %v3361_v2, %v272_v18  ;;  %v284_v10 = vld [vmem:[%s3374_s8 + $0xf8] sm:$0xff] }
  0x20   : > { %v401_v14 = vpack.c.bf16 %v376_v8, %v375_v7  ;;  %v377_v21 = vmax.f32 %v345_v12, 0.0  ;;  %v378_v22 = vmax.f32 %v346_v13, 0.0  ;;  %v379_v25 = vmax.f32 %v347_v15, 0.0 }
  0x21   : > { %v380_v26 = vmax.f32 %v348_v16, 0.0  ;;  %v312_v27 = vmul.f32 %v3361_v2, %v273_v19  ;;  %v313_v28 = vmul.f32 %v3361_v2, %v274_v20  ;;  %v349_v30 = vadd.f32 %v3367_v3, %v310_v23 }
  0x22   : > { %3089 = vmatmul.mubr.msk.bf16.gmra.mxu0 %vm419_vm1, %v398_v55  ;;  %v402_v29 = vpack.c.bf16 %v378_v22, %v377_v21  ;;  %v350_v31 = vadd.f32 %v3367_v3, %v311_v24  ;;  %v314_v41 = vmul.f32 %v3361_v2, %v275_v35  ;;  %v315_v42 = vmul.f32 %v3361_v2, %v276_v36  ;;  %v281_v55 = vld [vmem:[%s3374_s8 + $0xe0] sm:$0xff] }
  0x23   : > { %3092 = vmatprep.mubr.msk.bf16.mxu0 %vm419_vm1, %v399_v58  ;;  %v403_v32 = vpack.c.bf16 %v380_v26, %v379_v25  ;;  %v351_v33 = vadd.f32 %v3367_v3, %v312_v27  ;;  %v352_v34 = vadd.f32 %v3367_v3, %v313_v28  ;;  %v381_v39 = vmax.f32 %v349_v30, 0.0 }
  0x24   : > { %v382_v40 = vmax.f32 %v350_v31, 0.0  ;;  %v316_v45 = vmul.f32 %v3361_v2, %v277_v37  ;;  %v317_v46 = vmul.f32 %v3361_v2, %v278_v38  ;;  %v353_v48 = vadd.f32 %v3367_v3, %v314_v41 }
  0x25   : > { %v383_v43 = vmax.f32 %v351_v33, 0.0  ;;  %v384_v44 = vmax.f32 %v352_v34, 0.0  ;;  %v354_v49 = vadd.f32 %v3367_v3, %v315_v42  ;;  %v318_v59 = vmul.f32 %v3361_v2, %v279_v53 }
  0x26   : > { %v404_v47 = vpack.c.bf16 %v382_v40, %v381_v39  ;;  %v355_v51 = vadd.f32 %v3367_v3, %v316_v45  ;;  %v356_v52 = vadd.f32 %v3367_v3, %v317_v46  ;;  %v385_v57 = vmax.f32 %v353_v48, 0.0  ;;  %v3242_v48 = vld [vmem:[%s4365_s5 + $0x10] sm:$0xff]  }
  0x27   : > { %v405_v50 = vpack.c.bf16 %v384_v44, %v383_v43  ;;  %v386_v58 = vmax.f32 %v354_v49, 0.0  ;;  %v319_v60 = vmul.f32 %v3361_v2, %v280_v54  ;;  %v320_v63 = vmul.f32 %v3361_v2, %v281_v55  ;;  %v3243_v49 = vld [vmem:[%s4365_s5 + $0x28] sm:$0xff]   ;;  %3154 = vmatprep.subr.bf16.mxu0 %v3242_v48 }
  0x28   : > { %v387_v61 = vmax.f32 %v355_v51, 0.0  ;;  %v388_v62 = vmax.f32 %v356_v52, 0.0  ;;  %v321_v0 = vmul.f32 %v3361_v2, %v282_v56  ;;  %v357_v4 = vadd.f32 %v3367_v3, %v318_v59  ;;  %3116 = vmatprep.subr.bf16.mxu1 %v3243_v49  ;;  %3155 = vmatpush3.bf16.msra.mxu0 %v3242_v48 }
  0x29   : > { %v406_v1 = vpack.c.bf16 %v386_v58, %v385_v57  ;;  %v358_v5 = vadd.f32 %v3367_v3, %v319_v60  ;;  %v359_v7 = vadd.f32 %v3367_v3, %v320_v63  ;;  %v322_v13 = vmul.f32 %v3361_v2, %v283_v9  ;;  %v3245_v63 = vld [vmem:[%s4365_s5 + $0x20] sm:$0xff]   ;;  %3117 = vmatpush3.bf16.msra.mxu1 %v3243_v49 }
  0x2a   : > { %3093 = vmatmul.mubr.msk.bf16.gmra.mxu0 %vm419_vm1, %v400_v11  ;;  %v407_v6 = vpack.c.bf16 %v388_v62, %v387_v61  ;;  %v360_v8 = vadd.f32 %v3367_v3, %v321_v0  ;;  %v389_v11 = vmax.f32 %v357_v4, 0.0  ;;  %v3244_v62 = vld [vmem:[%s4365_s5 + $0x8] sm:$0xff]   ;;  %3118 = vmatprep.subr.bf16.mxu1 %v3245_v63  ;;  %v3246_v9 = vld [vmem:[%s4365_s5] sm:$0xff]  }
  0x2b   : > { %3096 = vmatprep.mubr.msk.bf16.mxu0 %vm419_vm1, %v401_v14  ;;  %v390_v12 = vmax.f32 %v358_v5, 0.0  ;;  %v323_v14 = vmul.f32 %v3361_v2, %v284_v10  ;;  %v391_v15 = vmax.f32 %v359_v7, 0.0  ;;  %v361_v18 = vadd.f32 %v3367_v3, %v322_v13  ;;  %v3491_v2 = vld [vmem:[%s4364_s4] ss:$0 sm:$0xff]  ;;  %3156 = vmatprep.subr.bf16.mxu0 %v3244_v62  ;;  %v3247_v10 = vld [vmem:[%s4365_s5 + $0x18] sm:$0xff]  }
  0x2c   : > { %v392_v16 = vmax.f32 %v360_v8, 0.0  ;;  %3157 = vmatpush3.bf16.msra.mxu0 %v3244_v62 }
  0x2d   : > { %v408_v17 = vpack.c.bf16 %v390_v12, %v389_v11  ;;  %v362_v19 = vadd.f32 %v3367_v3, %v323_v14  ;;  %v393_v21 = vmax.f32 %v361_v18, 0.0  ;;  %3119 = vmatpush3.bf16.msra.mxu1 %v3245_v63  ;;  %3158 = vmatprep.subr.bf16.mxu0 %v3246_v9 }
  0x2e   : > { %v409_v20 = vpack.c.bf16 %v392_v16, %v391_v15  ;;  %3120 = vmatprep.subr.bf16.mxu1 %v3247_v10 }
  0x2f   : > { %v394_v22 = vmax.f32 %v362_v19, 0.0 }
  0x30   : > { %3159 = vmatpush3.bf16.msra.mxu0 %v3246_v9 }
  0x31   : > { %v410_v23 = vpack.c.bf16 %v394_v22, %v393_v21  ;;  %3121 = vmatpush3.bf16.msra.mxu1 %v3247_v10 }
  0x32   : > { %3097 = vmatmul.mubr.msk.bf16.gmra.mxu0 %vm419_vm1, %v402_v29 }
  0x33   : > { %3100 = vmatprep.mubr.msk.bf16.mxu0 %vm419_vm1, %v403_v32 }
  0x3a   : > { %3101 = vmatmul.mubr.msk.bf16.gmra.mxu0 %vm419_vm1, %v404_v47 }
  0x3b   : > { %3104 = vmatprep.mubr.msk.bf16.mxu0 %vm419_vm1, %v405_v50 }
  0x42   : > { %3105 = vmatmul.mubr.msk.bf16.gmra.mxu0 %vm419_vm1, %v406_v1 }
  0x43   : > { %3108 = vmatprep.mubr.msk.bf16.mxu0 %vm419_vm1, %v407_v6 }
  0x4a   : > { %3109 = vmatmul.mubr.msk.bf16.gmra.mxu0 %vm419_vm1, %v408_v17 }
  0x4b   : > { %3112 = vmatprep.mubr.msk.bf16.mxu0 %vm419_vm1, %v409_v20 }
  0x52   : > { %3113 = vmatmul.mubr.msk.bf16.gmra.mxu0 %vm419_vm1, %v410_v23 }
  0xda   : > { %v3086_v24 = vpop.f32.mrf.mxu0 }
  0xdb   : > { %v515_v25 = vadd.f32 %v3086_v24, %v3491_v2 }
  0xdc   : > { %v506_v26 = vpop.f32.mrf.mxu0 }
  0xdd   : > { %v3494_v3 = vmax.f32 %v515_v25, 0.0  ;;  %v507_v27 = vadd.f32 %v3491_v2, %v506_v26 }
  0xde   : > { %v3087_v28 = vpop.f32.mrf.mxu0 }
  0xdf   : > { %v3497_v29 = vmax.f32 %v507_v27, 0.0  ;;  %v518_v30 = vadd.f32 %v3087_v28, %v3491_v2  ;;  %v2914_v32 = vpack.c.bf16 %v3494_v3, %v3494_v3  ;;  %v1191_v42 = vrot.slane %v3494_v3, 1 }
  0xe0   : > { %v509_v31 = vpop.f32.mrf.mxu0  ;;  %v4374_v52 = vrot.slane %v3494_v3, 7 }
  0xe1   : > { %v636_v33 = vmax.f32 %v518_v30, 0.0  ;;  %v510_v34 = vadd.f32 %v3491_v2, %v509_v31  ;;  %771 = vrot.lane.b32.xlu1 %v2914_v32, %s3307_s11  ;;  %v2912_v36 = vpack.c.bf16 %v3497_v29, %v3497_v29  ;;  %v4371_v58 = vrot.slane %v3497_v29, 7 }
  0xe2   : > { %v3090_v35 = vpop.f32.mrf.mxu0  ;;  %v1188_v8 = vrot.slane %v3497_v29, 1 }
  0xe3   : > { %v1192_v37 = vrot.slane %v636_v33, 1  ;;  %v634_v38 = vmax.f32 %v510_v34, 0.0  ;;  %v531_v39 = vadd.f32 %v3090_v35, %v3491_v2  ;;  %767 = vrot.lane.b32.xlu0 %v2912_v36, %s3307_s11  ;;  %v2915_v41 = vpack.c.bf16 %v636_v33, %v636_v33 }
  0xe4   : > { %v522_v40 = vpop.f32.mrf.mxu0  ;;  %v934_v44 = vrot.slane %v636_v33, 7 }
  0xe5   : > { %v1189_v43 = vrot.slane %v634_v38, 1  ;;  %773 = vrot.lane.b32.xlu1 %v2915_v41, %s3307_s11  ;;  %v2913_v46 = vpack.c.bf16 %v634_v38, %v634_v38  ;;  %v1269_v47 = vsel %vm1187_vm2, %v1192_v37, 0.0  ;;  %v3517_v50 = vmax.f32 %v531_v39, 0.0 }
  0xe6   : > { %v3091_v45 = vpop.f32.mrf.mxu0  ;;  %v1193_v51 = vsel %vm1187_vm2, %v1191_v42, %v1192_v37  ;;  %v931_v53 = vrot.slane %v634_v38, 7  ;;  %v2979_v56 = vpack.c.bf16 %v1269_v47, %v1269_v47  ;;  %v3529_v61 = vsel %vm929_vm3, %v4374_v52, %v934_v44 }
  0xe7   : > { %v534_v54 = vadd.f32 %v3091_v45, %v3491_v2  ;;  %769 = vrot.lane.b32.xlu0 %v2913_v46, %s3307_s11  ;;  %v1268_v57 = vsel %vm1187_vm2, %v1189_v43, 0.0  ;;  %v2978_v59 = vpack.c.bf16 %v1193_v51, %v1193_v51  ;;  %v2918_v0 = vpack.c.bf16 %v3517_v50, %v3517_v50 }
  0xe8   : > { %v525_v55 = vpop.f32.mrf.mxu0  ;;  %v2977_v5 = vpack.c.bf16 %v1268_v57, %v1268_v57  ;;  %v3544_v7 = vsel %vm929_vm3, %v4371_v58, %v931_v53  ;;  %v523_v11 = vadd.f32 %v3491_v2, %v522_v40  ;;  %v1190_v13 = vsel %vm1187_vm2, %v1188_v8, %v1189_v43 }
  0xe9   : > { %1386 = vrot.lane.b32.xlu1 %v2979_v56, %s3308_s16  ;;  %v640_v1 = vmax.f32 %v534_v54, 0.0  ;;  %v526_v4 = vadd.f32 %v3491_v2, %v525_v55  ;;  %v4370_v14 = vrot.slane %v3517_v50, 7  ;;  %v2976_v21 = vpack.c.bf16 %v1190_v13, %v1190_v13 }
  0xea   : > { %v3094_v60 = vpop.f32.mrf.mxu0  ;;  %v3558_v20 = vmax.f32 %v523_v11, 0.0  ;;  %v1197_v23 = vrot.slane %v3517_v50, 1 }
  0xeb   : > { %1384 = vrot.lane.b32.xlu0 %v2978_v59, %s3308_s16  ;;  %v940_v15 = vrot.slane %v640_v1, 7  ;;  %v638_v16 = vmax.f32 %v526_v4, 0.0  ;;  %v2919_v17 = vpack.c.bf16 %v640_v1, %v640_v1  ;;  %v1198_v19 = vrot.slane %v640_v1, 1 }
  0xec   : > { %v538_v6 = vpop.f32.mrf.mxu0  ;;  %v547_v24 = vadd.f32 %v3094_v60, %v3491_v2  ;;  %v4369_v31 = vrot.slane %v3558_v20, 7  ;;  %v2916_v33 = vpack.c.bf16 %v3558_v20, %v3558_v20  ;;  %v1194_v45 = vrot.slane %v3558_v20, 1 }
  0xed   : > { %1382 = vrot.lane.b32.xlu1 %v2977_v5, %s3308_s16  ;;  %v2917_v25 = vpack.c.bf16 %v638_v16, %v638_v16  ;;  %v3569_v27 = vsel %vm929_vm3, %v4370_v14, %v940_v15  ;;  %v1195_v28 = vrot.slane %v638_v16, 1  ;;  %v1271_v30 = vsel %vm1187_vm2, %v1198_v19, 0.0 }
  0xee   : > { %v3095_v12 = vpop.f32.mrf.mxu0  ;;  %v937_v32 = vrot.slane %v638_v16, 7  ;;  %v1199_v35 = vsel %vm1187_vm2, %v1197_v23, %v1198_v19  ;;  %v3577_v36 = vmax.f32 %v547_v24, 0.0  ;;  %v2983_v38 = vpack.c.bf16 %v1271_v30, %v1271_v30 }
  0xef   : > { %779 = vrot.lane.b32.xlu0 %v2918_v0, %s3307_s11  ;;  %v550_v37 = vadd.f32 %v3095_v12, %v3491_v2  ;;  %v539_v40 = vadd.f32 %v3491_v2, %v538_v6  ;;  %v1270_v41 = vsel %vm1187_vm2, %v1195_v28, 0.0  ;;  %v2982_v42 = vpack.c.bf16 %v1199_v35, %v1199_v35 }
  0xf0   : > { %v541_v18 = vpop.f32.mrf.mxu0  ;;  %v3589_v44 = vsel %vm929_vm3, %v4369_v31, %v937_v32  ;;  %v2981_v48 = vpack.c.bf16 %v1270_v41, %v1270_v41  ;;  %v2922_v49 = vpack.c.bf16 %v3577_v36, %v3577_v36  ;;  %v4368_v59 = vrot.slane %v3577_v36, 7 }
  0xf1   : > { %781 = vrot.lane.b32.xlu1 %v2919_v17, %s3307_s11  ;;  %v542_v46 = vadd.f32 %v3491_v2, %v541_v18  ;;  %v3593_v47 = vmax.f32 %v550_v37, 0.0  ;;  %v3599_v54 = vmax.f32 %v539_v40, 0.0  ;;  %v1196_v62 = vsel %vm1187_vm2, %v1194_v45, %v1195_v28 }
  0xf2   : > { %v3098_v22 = vpop.f32.mrf.mxu0  ;;  %v1203_v0 = vrot.slane %v3577_v36, 1  ;;  %v2980_v12 = vpack.c.bf16 %v1196_v62, %v1196_v62  ;;  %v3309_v35 = vmov 0  }
  0xf3   : > { %1380 = vrot.lane.b32.xlu0 %v2976_v21, %s3308_s16  ;;  %v3606_v60 = vmax.f32 %v542_v46, 0.0  ;;  %v1204_v1 = vrot.slane %v3593_v47, 1  ;;  %v2923_v4 = vpack.c.bf16 %v3593_v47, %v3593_v47  ;;  %v563_v5 = vadd.f32 %v3098_v22, %v3491_v2  ;;  %666 = vst.msk [vmem:[#allocation2] sm:$0xf] %vm665_vm4, %v3309_v35  ;;  %667 = vst.msk [vmem:[#allocation2 + $0x4] sm:$0xf] %vm665_vm4, %v3309_v35 }
  0xf4   : > { %v3564_v26 = vpop.f32.mrf.mxu0  ;;  %v4367_v8 = vrot.slane %v3599_v54, 7  ;;  %v2920_v9 = vpack.c.bf16 %v3599_v54, %v3599_v54  ;;  %669 = vst.msk [vmem:[#allocation2 + $0x88] sm:$0xf] %vm665_vm4, %v3309_v35  ;;  %670 = vst.msk [vmem:[#allocation2 + $0x8c] sm:$0xf] %vm665_vm4, %v3309_v35 }
  0xf5   : > { %777 = vrot.lane.b32.xlu1 %v2917_v25, %s3307_s11  ;;  %v1201_v17 = vrot.slane %v3606_v60, 1  ;;  %v2921_v18 = vpack.c.bf16 %v3606_v60, %v3606_v60  ;;  %v3632_v22 = vmax.f32 %v563_v5, 0.0  ;;  %v1273_v23 = vsel %vm1187_vm2, %v1204_v1, 0.0 }
  0xf6   : > { %v3099_v34 = vpop.f32.mrf.mxu0  ;;  %v1205_v30 = vsel %vm1187_vm2, %v1203_v0, %v1204_v1  ;;  %v943_v45 = vrot.slane %v3606_v60, 7 }
  0xf7   : > { %775 = vrot.lane.b32.xlu0 %v2916_v33, %s3307_s11  ;;  %v566_v28 = vadd.f32 %v3099_v34, %v3491_v2 }
  0xf8   : > { %v3581_v39 = vpop.f32.mrf.mxu0 }
  0xf9   : > { %1394 = vrot.lane.b32.xlu1 %v2983_v38, %s3308_s16  ;;  %v3673_v0 = vmax.f32 %v566_v28, 0.0 }
  0xfa   : > { %v3102_v43 = vpop.f32.mrf.mxu0 }
  0xfb   : > { %1392 = vrot.lane.b32.xlu0 %v2982_v42, %s3308_s16  ;;  %v579_v51 = vadd.f32 %v3102_v43, %v3491_v2  ;;  %v1200_v42 = vrot.slane %v3599_v54, 1  ;;  %v946_v43 = vrot.slane %v3593_v47, 7 }
  0xfc   : > { %v570_v53 = vpop.f32.mrf.mxu0 }
  0xfd   : > { %1390 = vrot.lane.b32.xlu1 %v2981_v48, %s3308_s16  ;;  %v3602_v55 = vmax.f32 %v579_v51, 0.0  ;;  %v571_v56 = vadd.f32 %v3491_v2, %v570_v53  ;;  %v555_v48 = vadd.f32 %v3491_v2, %v3564_v26  ;;  %v2986_v51 = vpack.c.bf16 %v1205_v30, %v1205_v30 }
  0xfe   : > { %v3103_v57 = vpop.f32.mrf.mxu0  ;;  %v2926_v26 = vpack.c.bf16 %v3632_v22, %v3632_v22  ;;  %v1202_v35 = vsel %vm1187_vm2, %v1200_v42, %v1201_v17 }
  0xff   : > { %v582_v63 = vadd.f32 %v3103_v57, %v3491_v2  ;;  %787 = vrot.lane.b32.xlu0 %v2922_v49, %s3307_s11  ;;  %v1215_v13 = vrot.slane %v3602_v55, 1  ;;  %v3624_v15 = vmax.f32 %v571_v56, 0.0  ;;  %v2987_v49 = vpack.c.bf16 %v1273_v23, %v1273_v23 }
 0x100   : > { %v573_v6 = vpop.f32.mrf.mxu0  ;;  %v1272_v57 = vsel %vm1187_vm2, %v1201_v17, 0.0  ;;  %v2984_v42 = vpack.c.bf16 %v1202_v35, %v1202_v35 }
 0x101   : > { %v3619_v10 = vmax.f32 %v582_v63, 0.0  ;;  %v574_v11 = vadd.f32 %v3491_v2, %v573_v6  ;;  %789 = vrot.lane.b32.xlu1 %v2923_v4, %s3307_s11  ;;  %v1212_v37 = vrot.slane %v3624_v15, 1  ;;  %v558_v6 = vadd.f32 %v3491_v2, %v3581_v39 }
 0x102   : > { %v3106_v16 = vpop.f32.mrf.mxu0  ;;  %v3697_v39 = vsel %vm929_vm3, %v4367_v8, %v943_v45  ;;  %v2927_v45 = vpack.c.bf16 %v3673_v0, %v3673_v0 }
 0x103   : > { %v1216_v19 = vrot.slane %v3619_v10, 1  ;;  %v3630_v21 = vmax.f32 %v574_v11, 0.0  ;;  %1388 = vrot.lane.b32.xlu0 %v2980_v12, %s3308_s16  ;;  %v595_v24 = vadd.f32 %v3106_v16, %v3491_v2  ;;  %v2985_v12 = vpack.c.bf16 %v1272_v57, %v1272_v57 }
 0x104   : > { %v586_v25 = vpop.f32.mrf.mxu0 }
 0x105   : > { %v1213_v32 = vrot.slane %v3630_v21, 1  ;;  %v587_v33 = vadd.f32 %v3491_v2, %v586_v25  ;;  %785 = vrot.lane.b32.xlu1 %v2921_v18, %s3307_s11  ;;  %v3647_v34 = vmax.f32 %v595_v24, 0.0  ;;  %v3650_v40 = vsel %vm1187_vm2, %v1216_v19, 0.0  ;;  %v3248_v18 = vld [vmem:[#allocation2] sm:$0xff]  }
 0x106   : > { %v3107_v38 = vpop.f32.mrf.mxu0  ;;  %v3653_v41 = vsel %vm1187_vm2, %v1215_v13, %v1216_v19  ;;  %v3692_v19 = vsel %vm929_vm3, %v4368_v59, %v946_v43  ;;  %3160 = vmatprep.mubr.msk.bf16.mxu0 %vm1684_vm5, %v3248_v18  ;;  %v3718_v43 = vmax.f32 %v558_v6, 0.0  ;;  %v4373_v6 = vrot.slane %v3632_v22, 7 }
 0x107   : > { %v598_v46 = vadd.f32 %v3107_v38, %v3491_v2  ;;  %783 = vrot.lane.b32.xlu0 %v2920_v9, %s3307_s11  ;;  %v3663_v56 = vsel %vm1187_vm2, %v1213_v32, 0.0  ;;  %v3668_v47 = vmax.f32 %v587_v33, 0.0  ;;  %v1221_v1 = vrot.slane %v3647_v34, 1 }
 0x108   : > { %v589_v53 = vpop.f32.mrf.mxu0  ;;  %v3680_v5 = vsel %vm1187_vm2, %v1212_v37, %v1213_v32  ;;  %v3716_v38 = vmax.f32 %v555_v48, 0.0  ;;  %v1207_v18 = vrot.slane %v3718_v43, 1 }
 0x109   : > { %v3670_v62 = vmax.f32 %v598_v46, 0.0  ;;  %v590_v63 = vadd.f32 %v3491_v2, %v589_v53  ;;  %1402 = vrot.lane.b32.xlu1 %v2987_v49, %s3308_s16  ;;  %v1218_v23 = vrot.slane %v3668_v47, 1 }
 0x10a   : > { %v3110_v4 = vpop.f32.mrf.mxu0 }
 0x10b   : > { %v1222_v9 = vrot.slane %v3670_v62, 1  ;;  %v3685_v11 = vmax.f32 %v590_v63, 0.0  ;;  %1400 = vrot.lane.b32.xlu0 %v2986_v51, %s3308_s16  ;;  %v611_v13 = vadd.f32 %v3110_v4, %v3491_v2  ;;  %v1210_v51 = vrot.slane %v3673_v0, 1 }
 0x10c   : > { %v602_v16 = vpop.f32.mrf.mxu0 }
 0x10d   : > { %v1219_v24 = vrot.slane %v3685_v11, 1  ;;  %1398 = vrot.lane.b32.xlu1 %v2985_v12, %s3308_s16  ;;  %v3702_v25 = vmax.f32 %v611_v13, 0.0  ;;  %v603_v28 = vadd.f32 %v3491_v2, %v602_v16  ;;  %v3706_v32 = vsel %vm1187_vm2, %v1222_v9, 0.0 }
 0x10e   : > { %v3111_v30 = vpop.f32.mrf.mxu0  ;;  %v3709_v33 = vsel %vm1187_vm2, %v1221_v1, %v1222_v9  ;;  %v2925_v9 = vpack.c.bf16 %v3718_v43, %v3718_v43  ;;  %v2924_v12 = vpack.c.bf16 %v3716_v38, %v3716_v38 }
 0x10f   : > { %v614_v37 = vadd.f32 %v3111_v30, %v3491_v2  ;;  %795 = vrot.lane.b32.xlu0 %v2926_v26, %s3307_s11  ;;  %v3724_v49 = vsel %vm1187_vm2, %v1219_v24, 0.0  ;;  %v1227_v48 = vrot.slane %v3702_v25, 1  ;;  %v3732_v53 = vmax.f32 %v603_v28, 0.0 }
 0x110   : > { %v605_v46 = vpop.f32.mrf.mxu0  ;;  %v3735_v63 = vsel %vm1187_vm2, %v1218_v23, %v1219_v24  ;;  %v1209_v26 = vrot.slane %v3632_v22, 1  ;;  %v1275_v23 = vsel %vm1187_vm2, %v1210_v51, 0.0 }
 0x111   : > { %v3727_v60 = vmax.f32 %v614_v37, 0.0  ;;  %v606_v17 = vadd.f32 %v3491_v2, %v605_v46  ;;  %797 = vrot.lane.b32.xlu1 %v2927_v45, %s3307_s11  ;;  %v1224_v30 = vrot.slane %v3732_v53, 1  ;;  %v2991_v8 = vpack.c.bf16 %v1275_v23, %v1275_v23 }
 0x112   : > { %v3114_v57 = vpop.f32.mrf.mxu0  ;;  %v2930_v23 = vpack.c.bf16 %v3602_v55, %v3602_v55 }
 0x113   : > { %v1228_v1 = vrot.slane %v3727_v60, 1  ;;  %v3739_v4 = vmax.f32 %v606_v17, 0.0  ;;  %1396 = vrot.lane.b32.xlu0 %v2984_v42, %s3308_s16  ;;  %v627_v13 = vadd.f32 %v3114_v57, %v3491_v2  ;;  %v4372_v17 = vrot.slane %v3716_v38, 7 }
 0x114   : > { %v618_v16 = vpop.f32.mrf.mxu0  ;;  %v1211_v42 = vsel %vm1187_vm2, %v1209_v26, %v1210_v51 }
 0x115   : > { %v1225_v24 = vrot.slane %v3739_v4, 1  ;;  %v619_v28 = vadd.f32 %v3491_v2, %v618_v16  ;;  %793 = vrot.lane.b32.xlu1 %v2925_v9, %s3307_s11  ;;  %v3754_v35 = vmax.f32 %v627_v13, 0.0  ;;  %v3757_v45 = vsel %vm1187_vm2, %v1228_v1, 0.0 }
 0x116   : > { %v3115_v37 = vpop.f32.mrf.mxu0  ;;  %v3760_v46 = vsel %vm1187_vm2, %v1227_v48, %v1228_v1  ;;  %v952_v9 = vrot.slane %v3673_v0, 7  ;;  %v949_v13 = vrot.slane %v3718_v43, 7  ;;  %v1206_v48 = vrot.slane %v3716_v38, 1 }
 0x117   : > { %v3764_v57 = vmax.f32 %v619_v28, 0.0  ;;  %v630_v16 = vadd.f32 %v3115_v37, %v3491_v2  ;;  %791 = vrot.lane.b32.xlu0 %v2924_v12, %s3307_s11  ;;  %v3771_v31 = vsel %vm1187_vm2, %v1225_v24, 0.0  ;;  %v1274_v1 = vsel %vm1187_vm2, %v1207_v18, 0.0 }
 0x118   : > { %v621_v59 = vpop.f32.mrf.mxu0  ;;  %v4375_v28 = vrot.slane %v3602_v55, 7  ;;  %v2990_v0 = vpack.c.bf16 %v1211_v42, %v1211_v42  ;;  %v1233_v43 = vrot.slane %v3754_v35, 1  ;;  %v3782_v12 = vsel %vm1187_vm2, %v1224_v30, %v1225_v24 }
 0x119   : > { %v3775_v51 = vmax.f32 %v630_v16, 0.0  ;;  %v622_v26 = vadd.f32 %v3491_v2, %v621_v59  ;;  %1410 = vrot.lane.b32.xlu1 %v2991_v8, %s3308_s16  ;;  %v1230_v37 = vrot.slane %v3764_v57, 1  ;;  %v958_v2 = vrot.slane %v3619_v10, 7 }
 0x11a   : > { %v2989_v59 = vpack.c.bf16 %v1274_v1, %v1274_v1  ;;  %v3795_v8 = vsel %vm929_vm3, %v4373_v6, %v952_v9  ;;  %v3800_v24 = vsel %vm929_vm3, %v4372_v17, %v949_v13  ;;  %v955_v42 = vrot.slane %v3630_v21, 7 }
 0x11b   : > { %v1234_v16 = vrot.slane %v3775_v51, 1  ;;  %v3788_v14 = vmax.f32 %v622_v26, 0.0  ;;  %1408 = vrot.lane.b32.xlu0 %v2990_v0, %s3308_s16  ;;  %v4376_v1 = vrot.slane %v3647_v34, 7  ;;  %v1208_v9 = vsel %vm1187_vm2, %v1206_v48, %v1207_v18 }
 0x11c   : > { %v964_v0 = vrot.slane %v3670_v62, 7  ;;  %v961_v6 = vrot.slane %v3685_v11, 7  ;;  %v2931_v18 = vpack.c.bf16 %v3619_v10, %v3619_v10  ;;  %v967_v17 = vrot.slane %v3739_v4, 7 }
 0x11d   : > { %v1231_v26 = vrot.slane %v3788_v14, 1  ;;  %v3806_v58 = vsel %vm1187_vm2, %v1234_v16, 0.0  ;;  %1406 = vrot.lane.b32.xlu1 %v2989_v59, %s3308_s16  ;;  %v3813_v13 = vsel %vm1187_vm2, %v1233_v43, %v1234_v16  ;;  %v970_v43 = vrot.slane %v3727_v60, 7 }
 0x11e   : > { %v3831_v16 = vsel %vm929_vm3, %v4375_v28, %v958_v2  ;;  %v2988_v10 = vpack.c.bf16 %v1208_v9, %v1208_v9  ;;  %v976_v48 = vrot.slane %v3775_v51, 7  ;;  %v3846_v2 = vsel %vm929_vm3, %v4376_v1, %v964_v0 }
 0x11f   : > { %v3818_v52 = vsel %vm1187_vm2, %v1231_v26, 0.0  ;;  %v3821_v30 = vsel %vm1187_vm2, %v1230_v37, %v1231_v26  ;;  %803 = vrot.lane.b32.xlu0 %v2930_v23, %s3307_s11  ;;  %4377 = vst [vmem:[#allocation3_spill] sm:$0xff] %v3831_v16  ;;  %v4378_v37 = vrot.slane %v3624_v15, 7  ;;  %v975_v26 = vrot.slane %v3754_v35, 7 }
 0x120   : > { %v972_v28 = vrot.slane %v3764_v57, 7  ;;  %v973_v59 = vrot.slane %v3788_v14, 7  ;;  %v4379_v16 = vrot.slane %v3668_v47, 7  ;;  %v2929_v9 = vpack.c.bf16 %v3630_v21, %v3630_v21 }
 0x121   : > { %v3838_v23 = vsel %vm929_vm3, %v4378_v37, %v955_v42  ;;  %805 = vrot.lane.b32.xlu1 %v2931_v18, %s3307_s11  ;;  %v3861_v18 = vld [vmem:[%s4365_s5 + $0x40] sm:$0xff]   ;;  %v4380_v0 = vrot.slane %v3702_v25, 7  ;;  %v4381_v1 = vrot.slane %v3732_v53, 7  ;;  %v2928_v21 = vpack.c.bf16 %v3624_v15, %v3624_v15 }
 0x122   : > { %v3853_v42 = vsel %vm929_vm3, %v4379_v16, %v961_v6  ;;  %3192 = vmatprep.subr.bf16.mxu1 %v3861_v18  ;;  %v3880_v16 = vsel %vm929_vm3, %v975_v26, %v976_v48  ;;  %v2993_v48 = vpack.c.bf16 %v3663_v56, %v3663_v56  ;;  %v2933_v56 = vpack.c.bf16 %v3685_v11, %v3685_v11 }
 0x123   : > { %1404 = vrot.lane.b32.xlu0 %v2988_v10, %s3308_s16  ;;  %v3866_v37 = vsel %vm929_vm3, %v4380_v0, %v970_v43  ;;  %v3871_v6 = vsel %vm929_vm3, %v4381_v1, %v967_v17  ;;  %v3885_v43 = vsel %vm929_vm3, %v972_v28, %v973_v59  ;;  %v2995_v17 = vpack.c.bf16 %v3650_v40, %v3650_v40 }
 0x124   : > { %v2994_v1 = vpack.c.bf16 %v3653_v41, %v3653_v41  ;;  %v2934_v10 = vpack.c.bf16 %v3647_v34, %v3647_v34  ;;  %v2935_v40 = vpack.c.bf16 %v3670_v62, %v3670_v62  ;;  %v2992_v41 = vpack.c.bf16 %v3680_v5, %v3680_v5 }
 0x125   : > { %801 = vrot.lane.b32.xlu1 %v2929_v9, %s3307_s11  ;;  %v2932_v59 = vpack.c.bf16 %v3668_v47, %v3668_v47  ;;  %v2999_v62 = vpack.c.bf16 %v3706_v32, %v3706_v32  ;;  %v2998_v5 = vpack.c.bf16 %v3709_v33, %v3709_v33  ;;  %v2997_v11 = vpack.c.bf16 %v3724_v49, %v3724_v49 }
 0x126   : > { %v2938_v9 = vpack.c.bf16 %v3702_v25, %v3702_v25  ;;  %v2939_v32 = vpack.c.bf16 %v3727_v60, %v3727_v60  ;;  %v2996_v33 = vpack.c.bf16 %v3735_v63, %v3735_v63  ;;  %v2937_v49 = vpack.c.bf16 %v3739_v4, %v3739_v4 }
 0x127   : > { %799 = vrot.lane.b32.xlu0 %v2928_v21, %s3307_s11  ;;  %v2936_v0 = vpack.c.bf16 %v3732_v53, %v3732_v53  ;;  %v3003_v60 = vpack.c.bf16 %v3757_v45, %v3757_v45  ;;  %v3002_v63 = vpack.c.bf16 %v3760_v46, %v3760_v46  ;;  %v3001_v4 = vpack.c.bf16 %v3771_v31, %v3771_v31 }
 0x128   : > { %v2942_v21 = vpack.c.bf16 %v3754_v35, %v3754_v35  ;;  %v2943_v45 = vpack.c.bf16 %v3775_v51, %v3775_v51  ;;  %v3000_v31 = vpack.c.bf16 %v3782_v12, %v3782_v12  ;;  %v4383_v46 = vrot.slane %v3497_v29, 7 }
 0x129   : > { %1418 = vrot.lane.b32.xlu1 %v2995_v17, %s3308_s16  ;;  %v4382_v17 = vrot.slane %v3494_v3, 7  ;;  %v2941_v3 = vpack.c.bf16 %v3788_v14, %v3788_v14  ;;  %v2940_v29 = vpack.c.bf16 %v3764_v57, %v3764_v57  ;;  %v3005_v14 = vpack.c.bf16 %v3818_v52, %v3818_v52 }
 0x12a   : > { %v3007_v52 = vpack.c.bf16 %v3806_v58, %v3806_v58  ;;  %v2975_v35 = vpack.c.bf16 %v3880_v16, %v3880_v16 }
 0x12b   : > { %1416 = vrot.lane.b32.xlu0 %v2994_v1, %s3308_s16  ;;  %v1011_v1 = vsel %vm929_vm3, 0.0, %v4382_v17 }
 0x12d   : > { %1414 = vrot.lane.b32.xlu1 %v2993_v48, %s3308_s16  ;;  %v1010_v48 = vsel %vm929_vm3, 0.0, %v4383_v46 }
 0x12e   : > { %v2944_v51 = vpack.c.bf16 %v1010_v48, %v1010_v48  ;;  %v3270_v48 = vld [vmem:[%s4365_s5 + $0x38] sm:$0xff]  }
 0x12f   : > { %811 = vrot.lane.b32.xlu0 %v2934_v10, %s3307_s11  ;;  %v2946_v10 = vpack.c.bf16 %v1011_v1, %v1011_v1 }
 0x131   : > { %813 = vrot.lane.b32.xlu1 %v2935_v40, %s3307_s11 }
 0x133   : > { %1412 = vrot.lane.b32.xlu0 %v2992_v41, %s3308_s16  ;;  %v2947_v41 = vpack.c.bf16 %v3529_v61, %v3529_v61  ;;  %v3004_v61 = vpack.c.bf16 %v3821_v30, %v3821_v30  ;;  %v4384_v30 = vrot.slane %v3517_v50, 7 }
 0x135   : > { %809 = vrot.lane.b32.xlu1 %v2933_v56, %s3307_s11 }
 0x137   : > { %807 = vrot.lane.b32.xlu0 %v2932_v59, %s3307_s11  ;;  %v2945_v59 = vpack.c.bf16 %v3544_v7, %v3544_v7 }
 0x139   : > { %1426 = vrot.lane.b32.xlu1 %v2999_v62, %s3308_s16 }
 0x13b   : > { %1424 = vrot.lane.b32.xlu0 %v2998_v5, %s3308_s16 }
 0x13d   : > { %1422 = vrot.lane.b32.xlu1 %v2997_v11, %s3308_s16  ;;  %v3006_v11 = vpack.c.bf16 %v3813_v13, %v3813_v13  ;;  %v2951_v13 = vpack.c.bf16 %v3569_v27, %v3569_v27 }
 0x13f   : > { %819 = vrot.lane.b32.xlu0 %v2938_v9, %s3307_s11  ;;  %v1013_v9 = vsel %vm929_vm3, 0.0, %v4384_v30 }
 0x140   : > { %v2950_v58 = vpack.c.bf16 %v1013_v9, %v1013_v9 }
 0x141   : > { %821 = vrot.lane.b32.xlu1 %v2939_v32, %s3307_s11 }
 0x143   : > { %1420 = vrot.lane.b32.xlu0 %v2996_v33, %s3308_s16 }
 0x145   : > { %817 = vrot.lane.b32.xlu1 %v2937_v49, %s3307_s11 }
 0x147   : > { %815 = vrot.lane.b32.xlu0 %v2936_v0, %s3307_s11  ;;  %v4385_v0 = vrot.slane %v3558_v20, 7 }
 0x149   : > { %1434 = vrot.lane.b32.xlu1 %v3003_v60, %s3308_s16  ;;  %v1012_v60 = vsel %vm929_vm3, 0.0, %v4385_v0  ;;  %v2957_v0 = vpack.c.bf16 %v3800_v24, %v3800_v24 }
 0x14a   : > { %v2948_v27 = vpack.c.bf16 %v1012_v60, %v1012_v60 }
 0x14b   : > { %1432 = vrot.lane.b32.xlu0 %v3002_v63, %s3308_s16  ;;  %v2949_v63 = vpack.c.bf16 %v3589_v44, %v3589_v44 }
 0x14d   : > { %1430 = vrot.lane.b32.xlu1 %v3001_v4, %s3308_s16 }
 0x14f   : > { %827 = vrot.lane.b32.xlu0 %v2942_v21, %s3307_s11 }
 0x151   : > { %829 = vrot.lane.b32.xlu1 %v2943_v45, %s3307_s11 }
 0x153   : > { %v772_v40 = vpop.permute.xlu1 %771  ;;  %1428 = vrot.lane.b32.xlu0 %v3000_v31, %s3308_s16  ;;  %v4386_v31 = vrot.slane %v3577_v36, 7 }
 0x154   : > { %867 = vst.msk [vmem:[#allocation2 + $0x10] sm:$0xf] %vm864_vm6, %v772_v40 }
 0x155   : > { %1157 = vst.msk [vmem:[#allocation2 + $0x10] sm:$0xf] %vm1154_vm7, %v2946_v10  ;;  %825 = vrot.lane.b32.xlu1 %v2941_v3, %s3307_s11  ;;  %v768_v12 = vpop.permute.xlu0 %767  ;;  %v1015_v46 = vsel %vm929_vm3, 0.0, %v4386_v31 }
 0x156   : > { %865 = vst.msk [vmem:[#allocation2 + $0x8] sm:$0xf] %vm864_vm6, %v768_v12  ;;  %v2954_v3 = vpack.c.bf16 %v1015_v46, %v1015_v46  ;;  %v2955_v12 = vpack.c.bf16 %v3692_v19, %v3692_v19 }
 0x157   : > { %1155 = vst.msk [vmem:[#allocation2 + $0x8] sm:$0xf] %vm1154_vm7, %v2944_v51  ;;  %v774_v56 = vpop.permute.xlu1 %773  ;;  %823 = vrot.lane.b32.xlu0 %v2940_v29, %s3307_s11  ;;  %v3275_v51 = vld [vmem:[%s4365_s5 + $0x30] sm:$0xff]  }
 0x158   : > { %868 = vst.msk [vmem:[#allocation2 + $0x14] sm:$0xf] %vm864_vm6, %v774_v56 }
 0x159   : > { %1158 = vst.msk [vmem:[#allocation2 + $0x14] sm:$0xf] %vm1154_vm7, %v2947_v41  ;;  %1438 = vrot.lane.b32.xlu1 %v3005_v14, %s3308_s16  ;;  %v770_v62 = vpop.permute.xlu0 %769  ;;  %v2953_v14 = vpack.c.bf16 %v3697_v39, %v3697_v39 }
 0x15a   : > { %866 = vst.msk [vmem:[#allocation2 + $0xc] sm:$0xf] %vm864_vm6, %v770_v62 }
 0x15b   : > { %1156 = vst.msk [vmem:[#allocation2 + $0xc] sm:$0xf] %vm1154_vm7, %v2945_v59  ;;  %v1387_v5 = vpop.permute.xlu1 %1386  ;;  %1436 = vrot.lane.b32.xlu0 %v3004_v61, %s3308_s16 }
 0x15c   : > { %1480 = vst.msk [vmem:[#allocation2 + $0x14] sm:$0xf] %vm1476_vm8, %v1387_v5 }
 0x15d   : > { %1442 = vrot.lane.b32.xlu1 %v3007_v52, %s3308_s16  ;;  %v1385_v7 = vpop.permute.xlu0 %1384 }
 0x15e   : > { %1479 = vst.msk [vmem:[#allocation2 + $0x10] sm:$0xf] %vm1476_vm8, %v1385_v7  ;;  %v4388_v7 = vrot.slane %v3632_v22, 7  ;;  %v2959_v22 = vpack.c.bf16 %v3795_v8, %v3795_v8 }
 0x15f   : > { %v1383_v32 = vpop.permute.xlu1 %1382  ;;  %1440 = vrot.lane.b32.xlu0 %v3006_v11, %s3308_s16 }
 0x160   : > { %1478 = vst.msk [vmem:[#allocation2 + $0xc] sm:$0xf] %vm1476_vm8, %v1383_v32  ;;  %v1017_v11 = vsel %vm929_vm3, 0.0, %v4388_v7 }
 0x161   : > { %v780_v33 = vpop.permute.xlu0 %779  ;;  %v2958_v32 = vpack.c.bf16 %v1017_v11, %v1017_v11  ;;  %v2965_v11 = vpack.c.bf16 %v3853_v42, %v3853_v42 }
 0x162   : > { %871 = vst.msk [vmem:[#allocation2 + $0x20] sm:$0xf] %vm864_vm6, %v780_v33 }
 0x163   : > { %1161 = vst.msk [vmem:[#allocation2 + $0x20] sm:$0xf] %vm1154_vm7, %v2950_v58  ;;  %v782_v49 = vpop.permute.xlu1 %781 }
 0x164   : > { %872 = vst.msk [vmem:[#allocation2 + $0x24] sm:$0xf] %vm864_vm6, %v782_v49  ;;  %v4389_v49 = vrot.slane %v3716_v38, 7 }
 0x165   : > { %1162 = vst.msk [vmem:[#allocation2 + $0x24] sm:$0xf] %vm1154_vm7, %v2951_v13  ;;  %v1381_v50 = vpop.permute.xlu0 %1380  ;;  %v3251_v44 = vld [vmem:[#allocation2 + $0x10] sm:$0xff]  }
 0x166   : > { %1477 = vst.msk [vmem:[#allocation2 + $0x8] sm:$0xf] %vm1476_vm8, %v1381_v50  ;;  %v3252_v40 = vld [vmem:[#allocation2 + $0x10] sm:$0xff]   ;;  %v1016_v50 = vsel %vm929_vm3, 0.0, %v4389_v49 }
 0x167   : > { %v778_v4 = vpop.permute.xlu1 %777  ;;  %v2956_v8 = vpack.c.bf16 %v1016_v50, %v1016_v50 }
 0x168   : > { %870 = vst.msk [vmem:[#allocation2 + $0x1c] sm:$0xf] %vm864_vm6, %v778_v4 }
 0x169   : > { %1160 = vst.msk [vmem:[#allocation2 + $0x1c] sm:$0xf] %vm1154_vm7, %v2949_v63  ;;  %v776_v21 = vpop.permute.xlu0 %775 }
 0x16a   : > { %869 = vst.msk [vmem:[#allocation2 + $0x18] sm:$0xf] %vm864_vm6, %v776_v21 }
 0x16b   : > { %1159 = vst.msk [vmem:[#allocation2 + $0x18] sm:$0xf] %vm1154_vm7, %v2948_v27  ;;  %v1395_v45 = vpop.permute.xlu1 %1394 }
 0x16c   : > { %1484 = vst.msk [vmem:[#allocation2 + $0x24] sm:$0xf] %vm1476_vm8, %v1395_v45  ;;  %v4390_v45 = vrot.slane %v3602_v55, 7  ;;  %v4391_v55 = vld [vmem:[#allocation3_spill] sm:$0xff] }
 0x16d   : > { %v1393_v20 = vpop.permute.xlu0 %1392  ;;  %v3249_v17 = vld [vmem:[#allocation2 + $0x8] sm:$0xff]   ;;  %v2963_v46 = vpack.c.bf16 %v4391_v55, %v4391_v55 }
 0x16e   : > { %1483 = vst.msk [vmem:[#allocation2 + $0x20] sm:$0xf] %vm1476_vm8, %v1393_v20  ;;  %v3250_v1 = vld [vmem:[#allocation2 + $0x8] sm:$0xff]   ;;  %3122 = vmatprep.mubr.msk.bf16.mxu1 %vm1684_vm5, %v3249_v17  ;;  %v1019_v20 = vsel %vm929_vm3, 0.0, %v4390_v45 }
 0x16f   : > { %v1391_v10 = vpop.permute.xlu1 %1390  ;;  %3161 = vmatmul.mubr.msk.bf16.vlgmr.msra.gmra.mxu0 %vm1684_vm5, %v3250_v1  ;;  %3123 = vmatmul.mubr.msk.bf16.vlgmr.msra.gmra.mxu1 %vm1684_vm5, %v3251_v44  ;;  %v2962_v44 = vpack.c.bf16 %v1019_v20, %v1019_v20 }
 0x170   : > { %1482 = vst.msk [vmem:[#allocation2 + $0x1c] sm:$0xf] %vm1476_vm8, %v1391_v10  ;;  %3164 = vmatprep.mubr.msk.bf16.mxu0 %vm1684_vm5, %v3252_v40  ;;  %3193 = vmatpush3.bf16.msra.mxu1 %v3861_v18  ;;  %v4387_v18 = vrot.slane %v3599_v54, 7  ;;  %v4392_v40 = vrot.slane %v3624_v15, 7 }
 0x171   : > { %v788_v36 = vpop.permute.xlu0 %787  ;;  %3194 = vmatprep.subr.bf16.mxu1 %v3270_v48 }
 0x172   : > { %875 = vst.msk [vmem:[#allocation2 + $0x30] sm:$0xf] %vm864_vm6, %v788_v36  ;;  %v1014_v56 = vsel %vm929_vm3, 0.0, %v4387_v18  ;;  %v2961_v36 = vpack.c.bf16 %v3838_v23, %v3838_v23 }
 0x173   : > { %1165 = vst.msk [vmem:[#allocation2 + $0x30] sm:$0xf] %vm1154_vm7, %v2954_v3  ;;  %v790_v29 = vpop.permute.xlu1 %789  ;;  %v2952_v19 = vpack.c.bf16 %v1014_v56, %v1014_v56  ;;  %v1018_v3 = vsel %vm929_vm3, 0.0, %v4392_v40  ;;  %v2973_v40 = vpack.c.bf16 %v3885_v43, %v3885_v43 }
 0x174   : > { %876 = vst.msk [vmem:[#allocation2 + $0x34] sm:$0xf] %vm864_vm6, %v790_v29  ;;  %3195 = vmatpush3.bf16.msra.mxu1 %v3270_v48 }
 0x175   : > { %1166 = vst.msk [vmem:[#allocation2 + $0x34] sm:$0xf] %vm1154_vm7, %v2955_v12  ;;  %v1389_v41 = vpop.permute.xlu0 %1388  ;;  %3196 = vmatprep.subr.bf16.mxu1 %v3275_v51  ;;  %v3255_v52 = vld [vmem:[#allocation2 + $0x20] sm:$0xff]   ;;  %v2960_v12 = vpack.c.bf16 %v1018_v3, %v1018_v3 }
 0x176   : > { %1481 = vst.msk [vmem:[#allocation2 + $0x18] sm:$0xf] %vm1476_vm8, %v1389_v41  ;;  %v3256_v9 = vld [vmem:[#allocation2 + $0x20] sm:$0xff]  }
 0x177   : > { %v786_v59 = vpop.permute.xlu1 %785 }
 0x178   : > { %874 = vst.msk [vmem:[#allocation2 + $0x2c] sm:$0xf] %vm864_vm6, %v786_v59  ;;  %3197 = vmatpush3.bf16.msra.mxu1 %v3275_v51 }
 0x179   : > { %1164 = vst.msk [vmem:[#allocation2 + $0x2c] sm:$0xf] %vm1154_vm7, %v2953_v14  ;;  %v784_v62 = vpop.permute.xlu0 %783  ;;  %v4393_v14 = vrot.slane %v3647_v34, 7  ;;  %v2967_v34 = vpack.c.bf16 %v3846_v2, %v3846_v2 }
 0x17a   : > { %873 = vst.msk [vmem:[#allocation2 + $0x28] sm:$0xf] %vm864_vm6, %v784_v62 }
 0x17b   : > { %1163 = vst.msk [vmem:[#allocation2 + $0x28] sm:$0xf] %vm1154_vm7, %v2952_v19  ;;  %v1403_v61 = vpop.permute.xlu1 %1402  ;;  %v1021_v59 = vsel %vm929_vm3, 0.0, %v4393_v14  ;;  %v3283_v14 = vld [vmem:[#allocation2 + $0x10] sm:$0xff]  }
 0x17c   : > { %1488 = vst.msk [vmem:[#allocation2 + $0x34] sm:$0xf] %vm1476_vm8, %v1403_v61  ;;  %v2966_v61 = vpack.c.bf16 %v1021_v59, %v1021_v59 }
 0x17d   : > { %v1401_v54 = vpop.permute.xlu0 %1400  ;;  %v3253_v5 = vld [vmem:[#allocation2 + $0x18] sm:$0xff]  }
 0x17e   : > { %1487 = vst.msk [vmem:[#allocation2 + $0x30] sm:$0xf] %vm1476_vm8, %v1401_v54  ;;  %v3254_v39 = vld [vmem:[#allocation2 + $0x18] sm:$0xff]   ;;  %3126 = vmatprep.mubr.msk.bf16.mxu1 %vm1684_vm5, %v3253_v5 }
 0x17f   : > { %v1399_v30 = vpop.permute.xlu1 %1398  ;;  %3165 = vmatmul.mubr.msk.bf16.gmra.mxu0 %vm1684_vm5, %v3254_v39  ;;  %3127 = vmatmul.mubr.msk.bf16.gmra.mxu1 %vm1684_vm5, %v3255_v52  ;;  %v4394_v52 = vrot.slane %v3668_v47, 7  ;;  %v3284_v59 = vld [vmem:[#allocation2 + $0x18] sm:$0xff]  }
 0x180   : > { %1486 = vst.msk [vmem:[#allocation2 + $0x2c] sm:$0xf] %vm1476_vm8, %v1399_v30  ;;  %3168 = vmatprep.mubr.msk.bf16.mxu0 %vm1684_vm5, %v3256_v9 }
 0x181   : > { %v796_v58 = vpop.permute.xlu0 %795  ;;  %v1020_v7 = vsel %vm929_vm3, 0.0, %v4394_v52 }
 0x182   : > { %879 = vst.msk [vmem:[#allocation2 + $0x40] sm:$0xf] %vm864_vm6, %v796_v58  ;;  %v2964_v2 = vpack.c.bf16 %v1020_v7, %v1020_v7 }
 0x183   : > { %1169 = vst.msk [vmem:[#allocation2 + $0x40] sm:$0xf] %vm1154_vm7, %v2958_v32  ;;  %v798_v33 = vpop.permute.xlu1 %797 }
 0x184   : > { %880 = vst.msk [vmem:[#allocation2 + $0x44] sm:$0xf] %vm864_vm6, %v798_v33  ;;  %v4395_v33 = vrot.slane %v3702_v25, 7  ;;  %v2971_v25 = vpack.c.bf16 %v3866_v37, %v3866_v37 }
 0x185   : > { %1170 = vst.msk [vmem:[#allocation2 + $0x44] sm:$0xf] %vm1154_vm7, %v2959_v22  ;;  %v1397_v13 = vpop.permute.xlu0 %1396  ;;  %v3259_v24 = vld [vmem:[#allocation2 + $0x30] sm:$0xff]  }
 0x186   : > { %1485 = vst.msk [vmem:[#allocation2 + $0x28] sm:$0xf] %vm1476_vm8, %v1397_v13  ;;  %v3260_v1 = vld [vmem:[#allocation2 + $0x30] sm:$0xff]   ;;  %v1023_v13 = vsel %vm929_vm3, 0.0, %v4395_v33 }
 0x187   : > { %v794_v60 = vpop.permute.xlu1 %793 }
 0x188   : > { %878 = vst.msk [vmem:[#allocation2 + $0x3c] sm:$0xf] %vm864_vm6, %v794_v60 }
 0x189   : > { %1168 = vst.msk [vmem:[#allocation2 + $0x3c] sm:$0xf] %vm1154_vm7, %v2957_v0  ;;  %v792_v63 = vpop.permute.xlu0 %791  ;;  %v2970_v0 = vpack.c.bf16 %v1023_v13, %v1023_v13 }
 0x18a   : > { %877 = vst.msk [vmem:[#allocation2 + $0x38] sm:$0xf] %vm864_vm6, %v792_v63 }
 0x18b   : > { %1167 = vst.msk [vmem:[#allocation2 + $0x38] sm:$0xf] %vm1154_vm7, %v2956_v8  ;;  %v1411_v4 = vpop.permute.xlu1 %1410 }
 0x18c   : > { %1492 = vst.msk [vmem:[#allocation2 + $0x44] sm:$0xf] %vm1476_vm8, %v1411_v4  ;;  %v4396_v4 = vrot.slane %v3732_v53, 7 }
 0x18d   : > { %v1409_v38 = vpop.permute.xlu0 %1408  ;;  %v3257_v27 = vld [vmem:[#allocation2 + $0x28] sm:$0xff]  }
 0x18e   : > { %1491 = vst.msk [vmem:[#allocation2 + $0x40] sm:$0xf] %vm1476_vm8, %v1409_v38  ;;  %v3258_v21 = vld [vmem:[#allocation2 + $0x28] sm:$0xff]   ;;  %3130 = vmatprep.mubr.msk.bf16.mxu1 %vm1684_vm5, %v3257_v27  ;;  %v1022_v38 = vsel %vm929_vm3, 0.0, %v4396_v4  ;;  %v2969_v27 = vpack.c.bf16 %v3871_v6, %v3871_v6 }
 0x18f   : > { %v1407_v17 = vpop.permute.xlu1 %1406  ;;  %3169 = vmatmul.mubr.msk.bf16.gmra.mxu0 %vm1684_vm5, %v3258_v21  ;;  %3131 = vmatmul.mubr.msk.bf16.gmra.mxu1 %vm1684_vm5, %v3259_v24  ;;  %v2968_v37 = vpack.c.bf16 %v1022_v38, %v1022_v38 }
 0x190   : > { %1490 = vst.msk [vmem:[#allocation2 + $0x3c] sm:$0xf] %vm1476_vm8, %v1407_v17  ;;  %3172 = vmatprep.mubr.msk.bf16.mxu0 %vm1684_vm5, %v3260_v1  ;;  %v1025_v1 = vsel %vm929_vm3, 0.0, %v975_v26 }
 0x191   : > { %v804_v31 = vpop.permute.xlu0 %803  ;;  %v2974_v55 = vpack.c.bf16 %v1025_v1, %v1025_v1 }
 0x192   : > { %883 = vst.msk [vmem:[#allocation2 + $0x50] sm:$0xf] %vm864_vm6, %v804_v31 }
 0x193   : > { %1173 = vst.msk [vmem:[#allocation2 + $0x50] sm:$0xf] %vm1154_vm7, %v2962_v44  ;;  %v806_v48 = vpop.permute.xlu1 %805 }
 0x194   : > { %884 = vst.msk [vmem:[#allocation2 + $0x54] sm:$0xf] %vm864_vm6, %v806_v48 }
 0x195   : > { %1174 = vst.msk [vmem:[#allocation2 + $0x54] sm:$0xf] %vm1154_vm7, %v2963_v46  ;;  %v1405_v10 = vpop.permute.xlu0 %1404  ;;  %v3263_v23 = vld [vmem:[#allocation2 + $0x40] sm:$0xff]  }
 0x196   : > { %1489 = vst.msk [vmem:[#allocation2 + $0x38] sm:$0xf] %vm1476_vm8, %v1405_v10  ;;  %v3264_v62 = vld [vmem:[#allocation2 + $0x40] sm:$0xff]   ;;  %v1024_v10 = vsel %vm929_vm3, 0.0, %v972_v28 }
 0x197   : > { %v802_v51 = vpop.permute.xlu1 %801  ;;  %v2972_v16 = vpack.c.bf16 %v1024_v10, %v1024_v10 }
 0x198   : > { %882 = vst.msk [vmem:[#allocation2 + $0x4c] sm:$0xf] %vm864_vm6, %v802_v51 }
 0x199   : > { %1172 = vst.msk [vmem:[#allocation2 + $0x4c] sm:$0xf] %vm1154_vm7, %v2961_v36  ;;  %v800_v29 = vpop.permute.xlu0 %799 }
 0x19a   : > { %881 = vst.msk [vmem:[#allocation2 + $0x48] sm:$0xf] %vm864_vm6, %v800_v29 }
 0x19b   : > { %1171 = vst.msk [vmem:[#allocation2 + $0x48] sm:$0xf] %vm1154_vm7, %v2960_v12  ;;  %v1419_v41 = vpop.permute.xlu1 %1418 }
 0x19c   : > { %1496 = vst.msk [vmem:[#allocation2 + $0x54] sm:$0xf] %vm1476_vm8, %v1419_v41 }
 0x19d   : > { %v1417_v15 = vpop.permute.xlu0 %1416  ;;  %v3261_v18 = vld [vmem:[#allocation2 + $0x38] sm:$0xff]  }
 0x19e   : > { %1495 = vst.msk [vmem:[#allocation2 + $0x50] sm:$0xf] %vm1476_vm8, %v1417_v15  ;;  %v3262_v56 = vld [vmem:[#allocation2 + $0x38] sm:$0xff]   ;;  %3134 = vmatprep.mubr.msk.bf16.mxu1 %vm1684_vm5, %v3261_v18 }
 0x19f   : > { %v1415_v19 = vpop.permute.xlu1 %1414  ;;  %3173 = vmatmul.mubr.msk.bf16.gmra.mxu0 %vm1684_vm5, %v3262_v56  ;;  %3135 = vmatmul.mubr.msk.bf16.gmra.mxu1 %vm1684_vm5, %v3263_v23 }
 0x1a0   : > { %1494 = vst.msk [vmem:[#allocation2 + $0x4c] sm:$0xf] %vm1476_vm8, %v1415_v19  ;;  %3176 = vmatprep.mubr.msk.bf16.mxu0 %vm1684_vm5, %v3264_v62  ;;  %v3285_v19 = vld [vmem:[#allocation2 + $0x20] sm:$0xff]   ;;  %v3286_v62 = vld [vmem:[#allocation2 + $0x28] sm:$0xff]  }
 0x1a1   : > { %v812_v54 = vpop.permute.xlu0 %811 }
 0x1a2   : > { %887 = vst.msk [vmem:[#allocation2 + $0x60] sm:$0xf] %vm864_vm6, %v812_v54  ;;  %v3288_v54 = vld [vmem:[#allocation2 + $0x38] sm:$0xff]  }
 0x1a3   : > { %1177 = vst.msk [vmem:[#allocation2 + $0x60] sm:$0xf] %vm1154_vm7, %v2966_v61  ;;  %v814_v5 = vpop.permute.xlu1 %813  ;;  %v3287_v61 = vld [vmem:[#allocation2 + $0x30] sm:$0xff]  }
 0x1a4   : > { %888 = vst.msk [vmem:[#allocation2 + $0x64] sm:$0xf] %vm864_vm6, %v814_v5 }
 0x1a5   : > { %1178 = vst.msk [vmem:[#allocation2 + $0x64] sm:$0xf] %vm1154_vm7, %v2967_v34  ;;  %v1413_v39 = vpop.permute.xlu0 %1412  ;;  %v3268_v42 = vld [vmem:[#allocation2 + $0x50] sm:$0xff]   ;;  %v3289_v34 = vld [vmem:[#allocation2 + $0x40] sm:$0xff]  }
 0x1a6   : > { %1493 = vst.msk [vmem:[#allocation2 + $0x48] sm:$0xf] %vm1476_vm8, %v1413_v39  ;;  %v3269_v50 = vld [vmem:[#allocation2 + $0x50] sm:$0xff]  }
 0x1a7   : > { %v810_v30 = vpop.permute.xlu1 %809  ;;  %v3291_v39 = vld [vmem:[#allocation2 + $0x50] sm:$0xff]  }
 0x1a8   : > { %886 = vst.msk [vmem:[#allocation2 + $0x5c] sm:$0xf] %vm864_vm6, %v810_v30 }
 0x1a9   : > { %1176 = vst.msk [vmem:[#allocation2 + $0x5c] sm:$0xf] %vm1154_vm7, %v2965_v11  ;;  %v808_v9 = vpop.permute.xlu0 %807 }
 0x1aa   : > { %885 = vst.msk [vmem:[#allocation2 + $0x58] sm:$0xf] %vm864_vm6, %v808_v9 }
 0x1ab   : > { %1175 = vst.msk [vmem:[#allocation2 + $0x58] sm:$0xf] %vm1154_vm7, %v2964_v2  ;;  %v1427_v32 = vpop.permute.xlu1 %1426 }
 0x1ac   : > { %1500 = vst.msk [vmem:[#allocation2 + $0x64] sm:$0xf] %vm1476_vm8, %v1427_v32  ;;  %v3298_v32 = vld [vmem:[#allocation2 + $0x88] sm:$0xff]  }
 0x1ad   : > { %v1425_v47 = vpop.permute.xlu0 %1424  ;;  %v3266_v58 = vld [vmem:[#allocation2 + $0x48] sm:$0xff]  }
 0x1ae   : > { %1499 = vst.msk [vmem:[#allocation2 + $0x60] sm:$0xf] %vm1476_vm8, %v1425_v47  ;;  %v3267_v22 = vld [vmem:[#allocation2 + $0x48] sm:$0xff]   ;;  %3138 = vmatprep.mubr.msk.bf16.mxu1 %vm1684_vm5, %v3266_v58 }
 0x1af   : > { %v1423_v49 = vpop.permute.xlu1 %1422  ;;  %3177 = vmatmul.mubr.msk.bf16.gmra.mxu0 %vm1684_vm5, %v3267_v22  ;;  %3139 = vmatmul.mubr.msk.bf16.gmra.mxu1 %vm1684_vm5, %v3268_v42  ;;  %v3290_v5 = vld [vmem:[#allocation2 + $0x48] sm:$0xff]  }
 0x1b0   : > { %1498 = vst.msk [vmem:[#allocation2 + $0x5c] sm:$0xf] %vm1476_vm8, %v1423_v49  ;;  %3180 = vmatprep.mubr.msk.bf16.mxu0 %vm1684_vm5, %v3269_v50 }
 0x1b1   : > { %v820_v60 = vpop.permute.xlu0 %819 }
 0x1b2   : > { %891 = vst.msk [vmem:[#allocation2 + $0x70] sm:$0xf] %vm864_vm6, %v820_v60 }
 0x1b3   : > { %1181 = vst.msk [vmem:[#allocation2 + $0x70] sm:$0xf] %vm1154_vm7, %v2970_v0  ;;  %v822_v8 = vpop.permute.xlu1 %821 }
 0x1b4   : > { %892 = vst.msk [vmem:[#allocation2 + $0x74] sm:$0xf] %vm864_vm6, %v822_v8 }
 0x1b5   : > { %1182 = vst.msk [vmem:[#allocation2 + $0x74] sm:$0xf] %vm1154_vm7, %v2971_v25  ;;  %v1421_v63 = vpop.permute.xlu0 %1420  ;;  %v3273_v6 = vld [vmem:[#allocation2 + $0x60] sm:$0xff]  }
 0x1b6   : > { %1497 = vst.msk [vmem:[#allocation2 + $0x58] sm:$0xf] %vm1476_vm8, %v1421_v63  ;;  %v3274_v31 = vld [vmem:[#allocation2 + $0x60] sm:$0xff]  }
 0x1b7   : > { %v818_v21 = vpop.permute.xlu1 %817  ;;  %v3293_v7 = vld [vmem:[#allocation2 + $0x60] sm:$0xff]  }
 0x1b8   : > { %890 = vst.msk [vmem:[#allocation2 + $0x6c] sm:$0xf] %vm864_vm6, %v818_v21 }
 0x1b9   : > { %1180 = vst.msk [vmem:[#allocation2 + $0x6c] sm:$0xf] %vm1154_vm7, %v2969_v27  ;;  %v816_v24 = vpop.permute.xlu0 %815 }
 0x1ba   : > { %889 = vst.msk [vmem:[#allocation2 + $0x68] sm:$0xf] %vm864_vm6, %v816_v24 }
 0x1bb   : > { %1179 = vst.msk [vmem:[#allocation2 + $0x68] sm:$0xf] %vm1154_vm7, %v2968_v37  ;;  %v1435_v45 = vpop.permute.xlu1 %1434 }
 0x1bc   : > { %1504 = vst.msk [vmem:[#allocation2 + $0x74] sm:$0xf] %vm1476_vm8, %v1435_v45 }
 0x1bd   : > { %v1433_v53 = vpop.permute.xlu0 %1432  ;;  %v3271_v20 = vld [vmem:[#allocation2 + $0x58] sm:$0xff]  }
 0x1be   : > { %1503 = vst.msk [vmem:[#allocation2 + $0x70] sm:$0xf] %vm1476_vm8, %v1433_v53  ;;  %v3272_v17 = vld [vmem:[#allocation2 + $0x58] sm:$0xff]   ;;  %3142 = vmatprep.mubr.msk.bf16.mxu1 %vm1684_vm5, %v3271_v20 }
 0x1bf   : > { %v1431_v44 = vpop.permute.xlu1 %1430  ;;  %3181 = vmatmul.mubr.msk.bf16.gmra.mxu0 %vm1684_vm5, %v3272_v17  ;;  %3143 = vmatmul.mubr.msk.bf16.gmra.mxu1 %vm1684_vm5, %v3273_v6  ;;  %v3292_v52 = vld [vmem:[#allocation2 + $0x58] sm:$0xff]  }
 0x1c0   : > { %1502 = vst.msk [vmem:[#allocation2 + $0x6c] sm:$0xf] %vm1476_vm8, %v1431_v44  ;;  %3184 = vmatprep.mubr.msk.bf16.mxu0 %vm1684_vm5, %v3274_v31 }
 0x1c1   : > { %v828_v46 = vpop.permute.xlu0 %827 }
 0x1c2   : > { %895 = vst.msk [vmem:[#allocation2 + $0x80] sm:$0xf] %vm864_vm6, %v828_v46 }
 0x1c3   : > { %1185 = vst.msk [vmem:[#allocation2 + $0x80] sm:$0xf] %vm1154_vm7, %v2974_v55  ;;  %v830_v26 = vpop.permute.xlu1 %829 }
 0x1c4   : > { %896 = vst.msk [vmem:[#allocation2 + $0x84] sm:$0xf] %vm864_vm6, %v830_v26 }
 0x1c5   : > { %1186 = vst.msk [vmem:[#allocation2 + $0x84] sm:$0xf] %vm1154_vm7, %v2975_v35  ;;  %v1429_v48 = vpop.permute.xlu0 %1428  ;;  %v3278_v43 = vld [vmem:[#allocation2 + $0x70] sm:$0xff]  }
 0x1c6   : > { %1501 = vst.msk [vmem:[#allocation2 + $0x68] sm:$0xf] %vm1476_vm8, %v1429_v48  ;;  %v3279_v41 = vld [vmem:[#allocation2 + $0x70] sm:$0xff]  }
 0x1c7   : > { %v826_v3 = vpop.permute.xlu1 %825  ;;  %v3295_v30 = vld [vmem:[#allocation2 + $0x70] sm:$0xff]  }
 0x1c8   : > { %894 = vst.msk [vmem:[#allocation2 + $0x7c] sm:$0xf] %vm864_vm6, %v826_v3 }
 0x1c9   : > { %1184 = vst.msk [vmem:[#allocation2 + $0x7c] sm:$0xf] %vm1154_vm7, %v2973_v40  ;;  %v824_v36 = vpop.permute.xlu0 %823 }
 0x1ca   : > { %893 = vst.msk [vmem:[#allocation2 + $0x78] sm:$0xf] %vm864_vm6, %v824_v36 }
 0x1cb   : > { %1183 = vst.msk [vmem:[#allocation2 + $0x78] sm:$0xf] %vm1154_vm7, %v2972_v16  ;;  %v1439_v51 = vpop.permute.xlu1 %1438 }
 0x1cc   : > { %1506 = vst.msk [vmem:[#allocation2 + $0x7c] sm:$0xf] %vm1476_vm8, %v1439_v51 }
 0x1cd   : > { %v1437_v57 = vpop.permute.xlu0 %1436  ;;  %v3276_v12 = vld [vmem:[#allocation2 + $0x68] sm:$0xff]  }
 0x1ce   : > { %1505 = vst.msk [vmem:[#allocation2 + $0x78] sm:$0xf] %vm1476_vm8, %v1437_v57  ;;  %v3277_v28 = vld [vmem:[#allocation2 + $0x68] sm:$0xff]   ;;  %3146 = vmatprep.mubr.msk.bf16.mxu1 %vm1684_vm5, %v3276_v12 }
 0x1cf   : > { %v1443_v29 = vpop.permute.xlu1 %1442  ;;  %3185 = vmatmul.mubr.msk.bf16.gmra.mxu0 %vm1684_vm5, %v3277_v28  ;;  %3147 = vmatmul.mubr.msk.bf16.gmra.mxu1 %vm1684_vm5, %v3278_v43  ;;  %v3294_v11 = vld [vmem:[#allocation2 + $0x68] sm:$0xff]  }
 0x1d0   : > { %1508 = vst.msk [vmem:[#allocation2 + $0x84] sm:$0xf] %vm1476_vm8, %v1443_v29  ;;  %3188 = vmatprep.mubr.msk.bf16.mxu0 %vm1684_vm5, %v3279_v41 }
 0x1d1   : > { %v1441_v15 = vpop.permute.xlu0 %1440 }
 0x1d2   : > { %1507 = vst.msk [vmem:[#allocation2 + $0x80] sm:$0xf] %vm1476_vm8, %v1441_v15 }
 0x1d5   : > { %v3280_v18 = vld [vmem:[#allocation2 + $0x78] sm:$0xff]  }
 0x1d6   : > { %v3281_v56 = vld [vmem:[#allocation2 + $0x78] sm:$0xff]   ;;  %3150 = vmatprep.mubr.msk.bf16.mxu1 %vm1684_vm5, %v3280_v18 }
 0x1d7   : > { %3189 = vmatmul.mubr.msk.bf16.gmra.mxu0 %vm1684_vm5, %v3281_v56  ;;  %v3296_v2 = vld [vmem:[#allocation2 + $0x78] sm:$0xff]  }
 0x1d9   : > { %v3282_v23 = vld [vmem:[#allocation2 + $0x80] sm:$0xff]  }
 0x1da   : > { %3151 = vmatmul.mubr.msk.bf16.gmra.mxu1 %vm1684_vm5, %v3282_v23  ;;  %v3297_v9 = vld [vmem:[#allocation2 + $0x80] sm:$0xff]  }
 0x1db   : > { %3198 = vmatprep.mubr.msk.bf16.mxu1 %vm1684_vm5, %v3283_v14 }
 0x1e2   : > { %3199 = vmatmul.mubr.msk.bf16.vlgmr.msra.gmra.mxu1 %vm1684_vm5, %v3284_v59 }
 0x1e3   : > { %3202 = vmatprep.mubr.msk.bf16.mxu1 %vm1684_vm5, %v3285_v19 }
 0x1ea   : > { %3203 = vmatmul.mubr.msk.bf16.gmra.mxu1 %vm1684_vm5, %v3286_v62 }
 0x1eb   : > { %3206 = vmatprep.mubr.msk.bf16.mxu1 %vm1684_vm5, %v3287_v61 }
 0x1f2   : > { %3207 = vmatmul.mubr.msk.bf16.gmra.mxu1 %vm1684_vm5, %v3288_v54 }
 0x1f3   : > { %3210 = vmatprep.mubr.msk.bf16.mxu1 %vm1684_vm5, %v3289_v34 }
 0x1fa   : > { %3211 = vmatmul.mubr.msk.bf16.gmra.mxu1 %vm1684_vm5, %v3290_v5 }
 0x1fb   : > { %3214 = vmatprep.mubr.msk.bf16.mxu1 %vm1684_vm5, %v3291_v39 }
 0x202   : > { %3215 = vmatmul.mubr.msk.bf16.gmra.mxu1 %vm1684_vm5, %v3292_v52 }
 0x203   : > { %3218 = vmatprep.mubr.msk.bf16.mxu1 %vm1684_vm5, %v3293_v7 }
 0x20a   : > { %3219 = vmatmul.mubr.msk.bf16.gmra.mxu1 %vm1684_vm5, %v3294_v11 }
 0x20b   : > { %3222 = vmatprep.mubr.msk.bf16.mxu1 %vm1684_vm5, %v3295_v30 }
 0x212   : > { %3223 = vmatmul.mubr.msk.bf16.gmra.mxu1 %vm1684_vm5, %v3296_v2 }
 0x213   : > { %3226 = vmatprep.mubr.msk.bf16.mxu1 %vm1684_vm5, %v3297_v9 }
 0x21a   : > { %3227 = vmatmul.mubr.msk.bf16.gmra.mxu1 %vm1684_vm5, %v3298_v32 }
 0x22f   : > { %v3124_v47 = vpop.f32.mrf.mxu1  ;;  %v3162_v27 = vpop.f32.mrf.mxu0 }
 0x230   : > { %v2083_v23 = vadd.f32 %v3162_v27, %v3124_v47 }
 0x231   : > { %v1767_v58 = vpop.f32.mrf.mxu1  ;;  %v2074_v37 = vpop.f32.mrf.mxu0 }
 0x232   : > { %v2075_v59 = vadd.f32 %v2074_v37, %v1767_v58 }
 0x233   : > { %v3125_v22 = vpop.f32.mrf.mxu1  ;;  %v3163_v45 = vpop.f32.mrf.mxu0 }
 0x234   : > { %v2086_v54 = vadd.f32 %v3163_v45, %v3125_v22 }
 0x235   : > { %v1770_v42 = vpop.f32.mrf.mxu1  ;;  %v2077_v20 = vpop.f32.mrf.mxu0 }
 0x236   : > { %v2078_v52 = vadd.f32 %v2077_v20, %v1770_v42 }
 0x23f   : > { %v3128_v33 = vpop.f32.mrf.mxu1  ;;  %v3166_v6 = vpop.f32.mrf.mxu0 }
 0x240   : > { %v2099_v30 = vadd.f32 %v3166_v6, %v3128_v33 }
 0x241   : > { %v4202_v13 = vpop.f32.mrf.mxu1  ;;  %v2090_v44 = vpop.f32.mrf.mxu0 }
 0x242   : > { %v2091_v47 = vadd.f32 %v2090_v44, %v4202_v13 }
 0x243   : > { %v4204_v49 = vpop.f32.mrf.mxu1  ;;  %v3167_v55 = vpop.f32.mrf.mxu0 }
 0x244   : > { %v2102_v42 = vadd.f32 %v3167_v55, %v4204_v49 }
 0x245   : > { %v4206_v50 = vpop.f32.mrf.mxu1  ;;  %v2093_v35 = vpop.f32.mrf.mxu0 }
 0x246   : > { %v2094_v45 = vadd.f32 %v2093_v35, %v4206_v50 }
 0x24f   : > { %v4208_v0 = vpop.f32.mrf.mxu1  ;;  %v3170_v48 = vpop.f32.mrf.mxu0 }
 0x250   : > { %v2115_v13 = vadd.f32 %v3170_v48, %v4208_v0 }
 0x251   : > { %v4210_v60 = vpop.f32.mrf.mxu1  ;;  %v2106_v40 = vpop.f32.mrf.mxu0 }
 0x252   : > { %v2107_v55 = vadd.f32 %v2106_v40, %v4210_v60 }
 0x253   : > { %v4212_v25 = vpop.f32.mrf.mxu1  ;;  %v3171_v36 = vpop.f32.mrf.mxu0 }
 0x254   : > { %v2118_v35 = vadd.f32 %v3171_v36, %v4212_v25 }
 0x255   : > { %v4214_v8 = vpop.f32.mrf.mxu1  ;;  %v2109_v57 = vpop.f32.mrf.mxu0 }
 0x256   : > { %v2110_v48 = vadd.f32 %v2109_v57, %v4214_v8 }
 0x25f   : > { %v4216_v63 = vpop.f32.mrf.mxu1  ;;  %v3174_v12 = vpop.f32.mrf.mxu0 }
 0x260   : > { %v2131_v40 = vadd.f32 %v3174_v12, %v4216_v63 }
 0x261   : > { %v4218_v4 = vpop.f32.mrf.mxu1  ;;  %v2122_v29 = vpop.f32.mrf.mxu0 }
 0x262   : > { %v2123_v25 = vadd.f32 %v2122_v29, %v4218_v4 }
 0x263   : > { %v4220_v38 = vpop.f32.mrf.mxu1  ;;  %v4254_v18 = vpop.f32.mrf.mxu0 }
 0x264   : > { %v2134_v57 = vadd.f32 %v4254_v18, %v4220_v38 }
 0x265   : > { %v4222_v21 = vpop.f32.mrf.mxu1  ;;  %v2125_v62 = vpop.f32.mrf.mxu0 }
 0x266   : > { %v2126_v12 = vadd.f32 %v2125_v62, %v4222_v21 }
 0x26f   : > { %v4224_v24 = vpop.f32.mrf.mxu1  ;;  %v3178_v5 = vpop.f32.mrf.mxu0 }
 0x271   : > { %v4226_v53 = vpop.f32.mrf.mxu1  ;;  %v2138_v9 = vpop.f32.mrf.mxu0 }
 0x272   : > { %v2139_v18 = vadd.f32 %v2138_v9, %v4226_v53 }
 0x273   : > { %v4228_v17 = vpop.f32.mrf.mxu1  ;;  %v3179_v37 = vpop.f32.mrf.mxu0 }
 0x274   : > { %v2150_v62 = vadd.f32 %v3179_v37, %v4228_v17 }
 0x275   : > { %v4230_v1 = vpop.f32.mrf.mxu1 }
 0x27f   : > { %v4232_v31 = vpop.f32.mrf.mxu1 }
 0x281   : > { %v4234_v46 = vpop.f32.mrf.mxu1 }
 0x283   : > { %v4236_v26 = vpop.f32.mrf.mxu1 }
 0x285   : > { %v4238_v10 = vpop.f32.mrf.mxu1 }
 0x28f   : > { %v4240_v3 = vpop.f32.mrf.mxu1 }
 0x291   : > { %v4242_v16 = vpop.f32.mrf.mxu1 }
 0x293   : > { %v4244_v51 = vpop.f32.mrf.mxu1 }
 0x295   : > { %v4246_v28 = vpop.f32.mrf.mxu1 }
 0x29a   : > { %v4248_v43 = vpop.f32.mrf.mxu1 }
 0x29c   : > { %v4250_v41 = vpop.f32.mrf.mxu1 }
 0x29e   : > { %v4252_v15 = vpop.f32.mrf.mxu1 }
 0x2a0   : > { %v4256_v56 = vpop.f32.mrf.mxu1 }
 0x2a2   : > { %v3200_v14 = vpop.f32.mrf.mxu1 }
 0x2a3   : > { %v2550_v19 = vadd.f32 %v3200_v14, %v2083_v23  ;;  %v2141_v23 = vpop.f32.mrf.mxu0 }
 0x2a4   : > { %v2421_v61 = vpop.f32.mrf.mxu1 }
 0x2a5   : > { %2582 = vst.msk [vmem:[%s4263_s12 + $0x10] sm:$0xff] %vm419_vm1, %v2550_v19  ;;  %v2548_v34 = vadd.f32 %v2421_v61, %v2075_v59  ;;  %v3182_v59 = vpop.f32.mrf.mxu0 }
 0x2a6   : > { %v3201_v39 = vpop.f32.mrf.mxu1  ;;  %v2163_v53 = vadd.f32 %v3182_v59, %v4232_v31 }
 0x2a7   : > { %2580 = vst.msk [vmem:[%s4263_s12] sm:$0xff] %vm419_vm1, %v2548_v34  ;;  %v2551_v7 = vadd.f32 %v3201_v39, %v2086_v54  ;;  %v2154_v54 = vpop.f32.mrf.mxu0 }
 0x2a8   : > { %v2424_v11 = vpop.f32.mrf.mxu1  ;;  %v2155_v37 = vadd.f32 %v2154_v54, %v4234_v46 }
 0x2a9   : > { %2583 = vst.msk [vmem:[%s4263_s12 + $0x18] sm:$0xff] %vm419_vm1, %v2551_v7  ;;  %v2549_v2 = vadd.f32 %v2424_v11, %v2078_v52  ;;  %v3183_v52 = vpop.f32.mrf.mxu0 }
 0x2aa   : > { %v3204_v32 = vpop.f32.mrf.mxu1 }
 0x2ab   : > { %2581 = vst.msk [vmem:[%s4263_s12 + $0x8] sm:$0xff] %vm419_vm1, %v2549_v2  ;;  %v2554_v58 = vadd.f32 %v3204_v32, %v2099_v30  ;;  %v2157_v4 = vpop.f32.mrf.mxu0  ;;  %v2147_v30 = vadd.f32 %v3178_v5, %v4224_v24  ;;  %v2142_v5 = vadd.f32 %v2141_v23, %v4230_v1  ;;  %v2166_v1 = vadd.f32 %v3183_v52, %v4236_v26 }
 0x2ac   : > { %v2437_v22 = vpop.f32.mrf.mxu1 }
 0x2ad   : > { %2586 = vst.msk [vmem:[%s4263_s12 + $0x30] sm:$0xff] %vm419_vm1, %v2554_v58  ;;  %v2552_v27 = vadd.f32 %v2437_v22, %v2091_v47  ;;  %v3186_v32 = vpop.f32.mrf.mxu0 }
 0x2ae   : > { %v3205_v33 = vpop.f32.mrf.mxu1  ;;  %v2179_v46 = vadd.f32 %v3186_v32, %v4240_v3 }
 0x2af   : > { %2584 = vst.msk [vmem:[%s4263_s12 + $0x20] sm:$0xff] %vm419_vm1, %v2552_v27  ;;  %v2555_v20 = vadd.f32 %v3205_v33, %v2102_v42  ;;  %v2170_v22 = vpop.f32.mrf.mxu0 }
 0x2b0   : > { %v2440_v6 = vpop.f32.mrf.mxu1  ;;  %v2171_v59 = vadd.f32 %v2170_v22, %v4242_v16 }
 0x2b1   : > { %2587 = vst.msk [vmem:[%s4263_s12 + $0x38] sm:$0xff] %vm419_vm1, %v2555_v20  ;;  %v2553_v44 = vadd.f32 %v2440_v6, %v2094_v45  ;;  %v3187_v33 = vpop.f32.mrf.mxu0 }
 0x2b2   : > { %v3208_v49 = vpop.f32.mrf.mxu1 }
 0x2b3   : > { %2585 = vst.msk [vmem:[%s4263_s12 + $0x28] sm:$0xff] %vm419_vm1, %v2553_v44  ;;  %v2558_v14 = vadd.f32 %v3208_v49, %v2115_v13  ;;  %v2173_v13 = vpop.f32.mrf.mxu0  ;;  %v2158_v44 = vadd.f32 %v2157_v4, %v4238_v10  ;;  %v2182_v10 = vadd.f32 %v3187_v33, %v4244_v51 }
 0x2b4   : > { %v2453_v50 = vpop.f32.mrf.mxu1 }
 0x2b5   : > { %2590 = vst.msk [vmem:[%s4263_s12 + $0x50] sm:$0xff] %vm419_vm1, %v2558_v14  ;;  %v2556_v19 = vadd.f32 %v2453_v50, %v2107_v55  ;;  %v3190_v14 = vpop.f32.mrf.mxu0 }
 0x2b6   : > { %v3209_v0 = vpop.f32.mrf.mxu1  ;;  %v2195_v16 = vadd.f32 %v3190_v14, %v4248_v43 }
 0x2b7   : > { %2588 = vst.msk [vmem:[%s4263_s12 + $0x40] sm:$0xff] %vm419_vm1, %v2556_v19  ;;  %v2559_v61 = vadd.f32 %v3209_v0, %v2118_v35  ;;  %v2186_v0 = vpop.f32.mrf.mxu0 }
 0x2b8   : > { %v2456_v60 = vpop.f32.mrf.mxu1 }
 0x2b9   : > { %2591 = vst.msk [vmem:[%s4263_s12 + $0x58] sm:$0xff] %vm419_vm1, %v2559_v61  ;;  %v2557_v34 = vadd.f32 %v2456_v60, %v2110_v48  ;;  %v2174_v48 = vadd.f32 %v2173_v13, %v4246_v28  ;;  %v3191_v51 = vpop.f32.mrf.mxu0 }
 0x2ba   : > { %v3212_v39 = vpop.f32.mrf.mxu1 }
 0x2bb   : > { %2589 = vst.msk [vmem:[%s4263_s12 + $0x48] sm:$0xff] %vm419_vm1, %v2557_v34  ;;  %v2562_v36 = vadd.f32 %v3212_v39, %v2131_v40  ;;  %v2187_v34 = vadd.f32 %v2186_v0, %v4250_v41  ;;  %v2189_v52 = vpop.f32.mrf.mxu0 }
 0x2bc   : > { %v2469_v8 = vpop.f32.mrf.mxu1 }
 0x2bd   : > { %2594 = vst.msk [vmem:[%s4263_s12 + $0x70] sm:$0xff] %vm419_vm1, %v2562_v36  ;;  %v2560_v7 = vadd.f32 %v2469_v8, %v2123_v25  ;;  %v2198_v25 = vadd.f32 %v3191_v51, %v4252_v15  ;;  %v2190_v8 = vadd.f32 %v2189_v52, %v4256_v56 }
 0x2be   : > { %v3213_v63 = vpop.f32.mrf.mxu1 }
 0x2bf   : > { %2592 = vst.msk [vmem:[%s4263_s12 + $0x60] sm:$0xff] %vm419_vm1, %v2560_v7  ;;  %v2563_v11 = vadd.f32 %v3213_v63, %v2134_v57 }
 0x2c0   : > { %v2472_v29 = vpop.f32.mrf.mxu1 }
 0x2c1   : > { %2595 = vst.msk [vmem:[%s4263_s12 + $0x78] sm:$0xff] %vm419_vm1, %v2563_v11  ;;  %v2561_v2 = vadd.f32 %v2472_v29, %v2126_v12 }
 0x2c2   : > { %v3216_v38 = vpop.f32.mrf.mxu1 }
 0x2c3   : > { %2593 = vst.msk [vmem:[%s4263_s12 + $0x68] sm:$0xff] %vm419_vm1, %v2561_v2  ;;  %v2566_v47 = vadd.f32 %v3216_v38, %v2147_v30 }
 0x2c4   : > { %v2485_v21 = vpop.f32.mrf.mxu1 }
 0x2c5   : > { %2598 = vst.msk [vmem:[%s4263_s12 + $0x90] sm:$0xff] %vm419_vm1, %v2566_v47  ;;  %v2564_v58 = vadd.f32 %v2485_v21, %v2139_v18 }
 0x2c6   : > { %v3217_v24 = vpop.f32.mrf.mxu1 }
 0x2c7   : > { %2596 = vst.msk [vmem:[%s4263_s12 + $0x80] sm:$0xff] %vm419_vm1, %v2564_v58  ;;  %v2567_v42 = vadd.f32 %v3217_v24, %v2150_v62 }
 0x2c8   : > { %v2488_v27 = vpop.f32.mrf.mxu1 }
 0x2c9   : > { %2599 = vst.msk [vmem:[%s4263_s12 + $0x98] sm:$0xff] %vm419_vm1, %v2567_v42  ;;  %v2565_v9 = vadd.f32 %v2488_v27, %v2142_v5 }
 0x2ca   : > { %v3220_v17 = vpop.f32.mrf.mxu1 }
 0x2cb   : > { %2597 = vst.msk [vmem:[%s4263_s12 + $0x88] sm:$0xff] %vm419_vm1, %v2565_v9  ;;  %v2570_v45 = vadd.f32 %v3220_v17, %v2163_v53 }
 0x2cc   : > { %v2501_v20 = vpop.f32.mrf.mxu1 }
 0x2cd   : > { %2602 = vst.msk [vmem:[%s4263_s12 + $0xb0] sm:$0xff] %vm419_vm1, %v2570_v45  ;;  %v2568_v6 = vadd.f32 %v2501_v20, %v2155_v37 }
 0x2ce   : > { %v3221_v31 = vpop.f32.mrf.mxu1 }
 0x2cf   : > { %2600 = vst.msk [vmem:[%s4263_s12 + $0xa0] sm:$0xff] %vm419_vm1, %v2568_v6  ;;  %v2571_v23 = vadd.f32 %v3221_v31, %v2166_v1 }
 0x2d0   : > { %v2504_v49 = vpop.f32.mrf.mxu1 }
 0x2d1   : > { %2603 = vst.msk [vmem:[%s4263_s12 + $0xb8] sm:$0xff] %vm419_vm1, %v2571_v23  ;;  %v2569_v55 = vadd.f32 %v2504_v49, %v2158_v44 }
 0x2d2   : > { %v3224_v26 = vpop.f32.mrf.mxu1 }
 0x2d3   : > { %2601 = vst.msk [vmem:[%s4263_s12 + $0xa8] sm:$0xff] %vm419_vm1, %v2569_v55  ;;  %v2574_v50 = vadd.f32 %v3224_v26, %v2179_v46 }
 0x2d4   : > { %v2517_v35 = vpop.f32.mrf.mxu1 }
 0x2d5   : > { %2606 = vst.msk [vmem:[%s4263_s12 + $0xd0] sm:$0xff] %vm419_vm1, %v2574_v50  ;;  %v2572_v19 = vadd.f32 %v2517_v35, %v2171_v59 }
 0x2d6   : > { %v3225_v3 = vpop.f32.mrf.mxu1 }
 0x2d7   : > { %2604 = vst.msk [vmem:[%s4263_s12 + $0xc0] sm:$0xff] %vm419_vm1, %v2572_v19  ;;  %v2575_v61 = vadd.f32 %v3225_v3, %v2182_v10 }
 0x2d8   : > { %v2520_v54 = vpop.f32.mrf.mxu1 }
 0x2d9   : > { %2607 = vst.msk [vmem:[%s4263_s12 + $0xd8] sm:$0xff] %vm419_vm1, %v2575_v61  ;;  %v2573_v60 = vadd.f32 %v2520_v54, %v2174_v48 }
 0x2da   : > { %v3228_v40 = vpop.f32.mrf.mxu1 }
 0x2db   : > { %2605 = vst.msk [vmem:[%s4263_s12 + $0xc8] sm:$0xff] %vm419_vm1, %v2573_v60  ;;  %v2578_v39 = vadd.f32 %v3228_v40, %v2195_v16 }
 0x2dc   : > { %v2533_v28 = vpop.f32.mrf.mxu1 }
 0x2dd   : > { %2610 = vst.msk [vmem:[%s4263_s12 + $0xf0] sm:$0xff] %vm419_vm1, %v2578_v39  ;;  %v2576_v36 = vadd.f32 %v2533_v28, %v2187_v34 }
 0x2de   : > { %v3229_v43 = vpop.f32.mrf.mxu1 }
 0x2df   : > { %2608 = vst.msk [vmem:[%s4263_s12 + $0xe0] sm:$0xff] %vm419_vm1, %v2576_v36  ;;  %v2579_v57 = vadd.f32 %v3229_v43, %v2198_v25 }
 0x2e0   : > { %v2536_v7 = vpop.f32.mrf.mxu1 }
 0x2e1   : > { %2611 = vst.msk [vmem:[%s4263_s12 + $0xf8] sm:$0xff] %vm419_vm1, %v2579_v57  ;;  %v2577_v41 = vadd.f32 %v2536_v7, %v2190_v8 }
 0x2e3   : > { %2609 = vst.msk [vmem:[%s4263_s12 + $0xe8] sm:$0xff] %vm419_vm1, %v2577_v41 }
 0x2e4 PF: > { %s16_s21 = sadd.s32 1, %s3305_s21  }
 0x2e5   : > { %p13_p4 = scmp.ge.s32.totalorder %s16_s21, 4  }
 0x2e7   :  { %15 = sbr.rel (!%p13_p4) target bundleno = 1 (0x1), region = 79 }

</bundles_post_ra>
